<compile_context>
chip_gen: v7x
topology: tpu7x:2x2x1
jax: 0.10.0
libtpu: 0.0.40
codegen_flags: <defaults>
</compile_context>

<pallas_src>
import functools

import jax
import jax.numpy as jnp
from jax.experimental import pallas as pl
from jax.experimental.pallas import tpu as pltpu


# ----------------------------------------------------------------------------
# VGG16 `features` architecture (torchvision layer indices 0..30).
# ----------------------------------------------------------------------------
VGG16_FEATURES_CFG = [
    ("conv", 3, 64), ("relu",), ("conv", 64, 64), ("relu",), ("pool",),
    ("conv", 64, 128), ("relu",), ("conv", 128, 128), ("relu",), ("pool",),
    ("conv", 128, 256), ("relu",), ("conv", 256, 256), ("relu",),
    ("conv", 256, 256), ("relu",), ("pool",),
    ("conv", 256, 512), ("relu",), ("conv", 512, 512), ("relu",),
    ("conv", 512, 512), ("relu",), ("pool",),
    ("conv", 512, 512), ("relu",), ("conv", 512, 512), ("relu",),
    ("conv", 512, 512), ("relu",), ("pool",),
]

_COMPILER_PARAMS = pltpu.CompilerParams(
    dimension_semantics=("parallel",),
    vmem_limit_bytes=32 * 1024 * 1024,
)


# ----------------------------------------------------------------------------
# Conv 3x3 (same padding) with optional fused bias/ReLU/2x2-max-pool epilogue.
# ----------------------------------------------------------------------------
def _conv3x3_kernel(x_ref, w_ref, b_ref, o_ref, acc_ref, *, H, W,
                    apply_relu, apply_pool, im2col):
    # x_ref : (1, H, W, Cin)           bf16 (unpadded image tile)
    # w_ref : (1, 9*Cin, Cout) if im2col else (3, 3*Cin, Cout)   bf16
    # b_ref : (1, Cout)                f32
    # o_ref : (1, HO, WO, Cout)        bf16
    # acc_ref: (H*W, Cout)             f32 VMEM scratch accumulator
    Cin = x_ref.shape[-1]
    Cout = o_ref.shape[-1]

    # Halo is built in VMEM -- no HBM round-trip through jnp.pad in the wrapper.
    xp = jnp.pad(x_ref[0], ((1, 1), (1, 1), (0, 0)))       # (H+2, W+2, Cin)

    def taps(dh):
        # dw = 0,1,2 shifted patches concatenated on the channel axis:
        # deepens the MXU contraction from Cin to 3*Cin.
        return jnp.concatenate(
            [xp[dh:dh + H, dw:dw + W, :].reshape(H * W, Cin) for dw in range(3)],
            axis=-1)                                         # (H*W, 3*Cin)

    if im2col:
        # First layer (Cin=3): full im2col -> single matmul with depth 9*Cin.
        patch = jnp.concatenate([taps(dh) for dh in range(3)], axis=-1)
        acc_ref[...] = jnp.dot(patch, w_ref[0],
                               preferred_element_type=jnp.float32)
    else:
        for dh in range(3):
            contrib = jnp.dot(taps(dh), w_ref[dh],
                              preferred_element_type=jnp.float32)
            if dh == 0:
                acc_ref[...] = contrib
            else:
                acc_ref[...] += contrib

    out = acc_ref[...] + b_ref[0]                            # f32 epilogue
    if apply_relu:
        out = jnp.maximum(out, 0.0)
    out = out.reshape(H, W, Cout)
    if apply_pool:
        out = out.reshape(H // 2, 2, W // 2, 2, Cout).max(axis=(1, 3))
    o_ref[0] = out.astype(o_ref.dtype)


def conv3x3(x_nhwc, w_hwio, b, *, apply_relu, apply_pool):
    N, H, W, Cin = x_nhwc.shape
    Cout = w_hwio.shape[-1]
    im2col = Cin <= 8
    if im2col:
        w_k = w_hwio.reshape(1, 9 * Cin, Cout)   # rows ordered (dh, dw, cin)
    else:
        w_k = w_hwio.reshape(3, 3 * Cin, Cout)   # per dh, rows ordered (dw, cin)
    KH, KC = w_k.shape[0], w_k.shape[1]
    HO, WO = (H // 2, W // 2) if apply_pool else (H, W)

    kern = functools.partial(_conv3x3_kernel, H=H, W=W,
                             apply_relu=apply_relu, apply_pool=apply_pool,
                             im2col=im2col)
    return pl.pallas_call(
        kern,
        out_shape=jax.ShapeDtypeStruct((N, HO, WO, Cout), jnp.bfloat16),
        grid_spec=pltpu.PrefetchScalarGridSpec(
            num_scalar_prefetch=0,
            grid=(N,),
            in_specs=[
                pl.BlockSpec((1, H, W, Cin), lambda n: (n, 0, 0, 0)),
                pl.BlockSpec((KH, KC, Cout), lambda n: (0, 0, 0)),
                pl.BlockSpec((1, Cout), lambda n: (0, 0)),
            ],
            out_specs=pl.BlockSpec((1, HO, WO, Cout), lambda n: (n, 0, 0, 0)),
            scratch_shapes=[pltpu.VMEM((H * W, Cout), jnp.float32)],
        ),
        compiler_params=_COMPILER_PARAMS,
    )(x_nhwc, w_k, b.reshape(1, Cout))


# ----------------------------------------------------------------------------
# Standalone ReLU (used only when the pre-ReLU activation is a requested output)
# ----------------------------------------------------------------------------
def _relu_kernel(x_ref, o_ref):
    o_ref[...] = jnp.maximum(x_ref[...], 0.0).astype(o_ref.dtype)


def relu(x_nhwc):
    N, H, W, C = x_nhwc.shape
    return pl.pallas_call(
        _relu_kernel,
        out_shape=jax.ShapeDtypeStruct(x_nhwc.shape, x_nhwc.dtype),
        grid_spec=pltpu.PrefetchScalarGridSpec(
            num_scalar_prefetch=0,
            grid=(N,),
            in_specs=[pl.BlockSpec((1, H, W, C), lambda n: (n, 0, 0, 0))],
            out_specs=pl.BlockSpec((1, H, W, C), lambda n: (n, 0, 0, 0)),
        ),
        compiler_params=_COMPILER_PARAMS,
    )(x_nhwc)


# ----------------------------------------------------------------------------
# Standalone 2x2 stride-2 max-pool (contiguous reshape + max; no strided pl.ds)
# ----------------------------------------------------------------------------
def _maxpool2x2_kernel(x_ref, o_ref, *, HO, WO):
    C = x_ref.shape[-1]
    x = x_ref[0].reshape(HO, 2, WO, 2, C)
    o_ref[0] = jnp.max(x, axis=(1, 3)).astype(o_ref.dtype)


def maxpool2x2(x_nhwc):
    N, H, W, C = x_nhwc.shape
    HO, WO = H // 2, W // 2
    kern = functools.partial(_maxpool2x2_kernel, HO=HO, WO=WO)
    return pl.pallas_call(
        kern,
        out_shape=jax.ShapeDtypeStruct((N, HO, WO, C), x_nhwc.dtype),
        grid_spec=pltpu.PrefetchScalarGridSpec(
            num_scalar_prefetch=0,
            grid=(N,),
            in_specs=[pl.BlockSpec((1, H, W, C), lambda n: (n, 0, 0, 0))],
            out_specs=pl.BlockSpec((1, HO, WO, C), lambda n: (n, 0, 0, 0)),
        ),
        compiler_params=_COMPILER_PARAMS,
    )(x_nhwc)


# ----------------------------------------------------------------------------
# Parameters + module wrapper
# ----------------------------------------------------------------------------
def init_vgg16_params(key, last_layer):
    params = {}
    for i, layer in enumerate(VGG16_FEATURES_CFG[: last_layer + 1]):
        if layer[0] == "conv":
            _, cin, cout = layer
            kw, kb = jax.random.split(jax.random.fold_in(key, i))
            scale = 1.0 / jnp.sqrt(jnp.float32(3 * 3 * cin))
            w = (jax.random.normal(kw, (3, 3, cin, cout), jnp.float32)
                 * scale).astype(jnp.bfloat16)
            b = jax.random.normal(kb, (cout,), jnp.float32) * 0.01
            params[i] = (w, b)
    return params


class NetVGGFeatures:
    """Mirror of the PyTorch module: runs vgg16.features[0 .. layer_ids[-1]]
    and collects the activations at every index in layer_ids (NCHW in,
    list of NCHW tensors out). ReLU / max-pool layers are fused into the
    preceding conv kernel whenever their inputs are not requested outputs."""

    def __init__(self, layer_ids, key=jax.random.PRNGKey(42)):
        self.layer_ids = list(layer_ids)
        self.params = init_vgg16_params(key, self.layer_ids[-1])

    def __call__(self, x_nchw):
        x = jnp.transpose(x_nchw, (0, 2, 3, 1)).astype(jnp.bfloat16)  # -> NHWC
        last = self.layer_ids[-1]
        collected = {}
        i = 0
        while i <= last:
            kind = VGG16_FEATURES_CFG[i][0]
            if kind == "conv":
                w, b = self.params[i]
                fuse_relu = (
                    i not in self.layer_ids
                    and i + 1 <= last
                    and VGG16_FEATURES_CFG[i + 1][0] == "relu"
                )
                fuse_pool = (
                    fuse_relu
                    and (i + 1) not in self.layer_ids
                    and i + 2 <= last
                    and VGG16_FEATURES_CFG[i + 2][0] == "pool"
                )
                x = conv3x3(x, w, b, apply_relu=fuse_relu, apply_pool=fuse_pool)
                end = i + int(fuse_relu) + int(fuse_pool)
                if end in self.layer_ids:
                    collected[end] = x
                i = end + 1
            elif kind == "relu":
                x = relu(x)
                if i in self.layer_ids:
                    collected[i] = x
                i += 1
            else:  # pool
                x = maxpool2x2(x)
                if i in self.layer_ids:
                    collected[i] = x
                i += 1
        return [jnp.transpose(collected[j], (0, 3, 1, 2)).astype(jnp.float32)
                for j in self.layer_ids]


# ----------------------------------------------------------------------------
# Pure-JAX reference (same bf16 cast points, f32 accumulation)
# ----------------------------------------------------------------------------
def _reference_forward(net, x_nchw):
    x = jnp.transpose(x_nchw, (0, 2, 3, 1)).astype(jnp.bfloat16)
    outs = {}
    for i in range(net.layer_ids[-1] + 1):
        kind = VGG16_FEATURES_CFG[i][0]
        if kind == "conv":
            w, b = net.params[i]
            y = jax.lax.conv_general_dilated(
                x, w, window_strides=(1, 1), padding="SAME",
                dimension_numbers=("NHWC", "HWIO", "NHWC"),
                preferred_element_type=jnp.float32,
                precision=jax.lax.Precision.HIGHEST,
            ) + b
            x = y.astype(jnp.bfloat16)
        elif kind == "relu":
            x = jnp.maximum(x, jnp.zeros((), x.dtype))
        else:
            x = jax.lax.reduce_window(
                x, jnp.array(-jnp.inf, x.dtype), jax.lax.max,
                window_dimensions=(1, 2, 2, 1),
                window_strides=(1, 2, 2, 1), padding="VALID",
            )
        if i in net.layer_ids:
            outs[i] = x
    return [jnp.transpose(outs[j], (0, 3, 1, 2)).astype(jnp.float32)
            for j in net.layer_ids]


if __name__ == "__main__":
    key = jax.random.PRNGKey(0)
    # PyTorch-style NCHW input: batch=2, 3 channels (VGG requires 3), 16x16.
    x = jax.random.normal(key, (2, 3, 16, 16), jnp.float32)

    # Exercises: fused conv+relu, conv alone (pre-ReLU output requested),
    # standalone relu, standalone pool, and both conv contraction paths.
    layer_ids = [2, 4, 8]
    net = NetVGGFeatures(layer_ids)

    feats = net(x)
    feats = [jax.block_until_ready(f) for f in feats]

    expected_shapes = [(2, 64, 16, 16), (2, 64, 8, 8), (2, 128, 8, 8)]
    assert [tuple(f.shape) for f in feats] == expected_shapes, \
        [tuple(f.shape) for f in feats]

    refs = _reference_forward(net, x)
    for f, r in zip(feats, refs):
        assert jnp.allclose(f, r, rtol=2e-2, atol=2e-2), \
            float(jnp.max(jnp.abs(f - r)))

    print("KERNEL_OK")
</pallas_src>

<mosaic_0001>
module attributes {stable_mosaic.version = 11 : i64} {
  func.func @_conv3x3_kernel(%arg0: i32, %arg1: memref<1x16x16x3xbf16, #tpu.memory_space<vmem>>, %arg2: memref<1x27x64xbf16, #tpu.memory_space<vmem>>, %arg3: memref<1x64xf32, #tpu.memory_space<vmem>>, %arg4: memref<1x16x16x64xbf16, #tpu.memory_space<vmem>>, %arg5: memref<256x64xf32, #tpu.memory_space<vmem>>) attributes {dimension_semantics = [#tpu.dimension_semantics<parallel>], iteration_bounds = array<i64: 2>, scalar_prefetch = 0 : i64, scratch_operands = 1 : i64, tpu.core_type = #tpu.core_type<tc>, window_params = [{transform_indices = @transform_0, window_bounds = array<i64: 1, 16, 16, 3>}, {pipeline_mode = #tpu.pipeline_mode<synchronous>, transform_indices = @transform_1, window_bounds = array<i64: 1, 27, 64>}, {pipeline_mode = #tpu.pipeline_mode<synchronous>, transform_indices = @transform_2, window_bounds = array<i64: 1, 64>}, {transform_indices = @transform_3, window_bounds = array<i64: 1, 16, 16, 64>}]} {
    %c0 = arith.constant 0 : index
    %c0_0 = arith.constant 0 : index
    %c0_1 = arith.constant 0 : index
    %c0_2 = arith.constant 0 : index
    %0 = vector.load %arg1[%c0, %c0_0, %c0_1, %c0_2] : memref<1x16x16x3xbf16, #tpu.memory_space<vmem>>, vector<1x16x16x3xbf16>
    %1 = vector.shape_cast %0 : vector<1x16x16x3xbf16> to vector<16x16x3xbf16>
    %c0_i32 = arith.constant 0 : i32
    %2 = arith.sitofp %c0_i32 : i32 to bf16
    %3 = vector.broadcast %2 : bf16 to vector<1x16x3xbf16>
    %4 = tpu.concatenate %3, %1 in 0 : vector<1x16x3xbf16>, vector<16x16x3xbf16> -> vector<17x16x3xbf16>
    %5 = vector.broadcast %2 : bf16 to vector<1x16x3xbf16>
    %6 = tpu.concatenate %4, %5 in 0 : vector<17x16x3xbf16>, vector<1x16x3xbf16> -> vector<18x16x3xbf16>
    %7 = vector.broadcast %2 : bf16 to vector<18x1x3xbf16>
    %8 = tpu.concatenate %7, %6 in 1 : vector<18x1x3xbf16>, vector<18x16x3xbf16> -> vector<18x17x3xbf16>
    %9 = vector.broadcast %2 : bf16 to vector<18x1x3xbf16>
    %10 = tpu.concatenate %8, %9 in 1 : vector<18x17x3xbf16>, vector<18x1x3xbf16> -> vector<18x18x3xbf16>
    %11 = vector.extract_strided_slice %10 {offsets = [0, 0, 0], sizes = [16, 16, 3], strides = [1, 1, 1]} : vector<18x18x3xbf16> to vector<16x16x3xbf16>
    %12 = vector.shape_cast %11 : vector<16x16x3xbf16> to vector<256x3xbf16>
    %13 = vector.extract_strided_slice %10 {offsets = [0, 1, 0], sizes = [16, 16, 3], strides = [1, 1, 1]} : vector<18x18x3xbf16> to vector<16x16x3xbf16>
    %14 = vector.shape_cast %13 : vector<16x16x3xbf16> to vector<256x3xbf16>
    %15 = vector.extract_strided_slice %10 {offsets = [0, 2, 0], sizes = [16, 16, 3], strides = [1, 1, 1]} : vector<18x18x3xbf16> to vector<16x16x3xbf16>
    %16 = vector.shape_cast %15 : vector<16x16x3xbf16> to vector<256x3xbf16>
    %17 = tpu.concatenate %12, %14, %16 in 1 : vector<256x3xbf16>, vector<256x3xbf16>, vector<256x3xbf16> -> vector<256x9xbf16>
    %18 = vector.extract_strided_slice %10 {offsets = [1, 0, 0], sizes = [16, 16, 3], strides = [1, 1, 1]} : vector<18x18x3xbf16> to vector<16x16x3xbf16>
    %19 = vector.shape_cast %18 : vector<16x16x3xbf16> to vector<256x3xbf16>
    %20 = vector.extract_strided_slice %10 {offsets = [1, 1, 0], sizes = [16, 16, 3], strides = [1, 1, 1]} : vector<18x18x3xbf16> to vector<16x16x3xbf16>
    %21 = vector.shape_cast %20 : vector<16x16x3xbf16> to vector<256x3xbf16>
    %22 = vector.extract_strided_slice %10 {offsets = [1, 2, 0], sizes = [16, 16, 3], strides = [1, 1, 1]} : vector<18x18x3xbf16> to vector<16x16x3xbf16>
    %23 = vector.shape_cast %22 : vector<16x16x3xbf16> to vector<256x3xbf16>
    %24 = tpu.concatenate %19, %21, %23 in 1 : vector<256x3xbf16>, vector<256x3xbf16>, vector<256x3xbf16> -> vector<256x9xbf16>
    %25 = vector.extract_strided_slice %10 {offsets = [2, 0, 0], sizes = [16, 16, 3], strides = [1, 1, 1]} : vector<18x18x3xbf16> to vector<16x16x3xbf16>
    %26 = vector.shape_cast %25 : vector<16x16x3xbf16> to vector<256x3xbf16>
    %27 = vector.extract_strided_slice %10 {offsets = [2, 1, 0], sizes = [16, 16, 3], strides = [1, 1, 1]} : vector<18x18x3xbf16> to vector<16x16x3xbf16>
    %28 = vector.shape_cast %27 : vector<16x16x3xbf16> to vector<256x3xbf16>
    %29 = vector.extract_strided_slice %10 {offsets = [2, 2, 0], sizes = [16, 16, 3], strides = [1, 1, 1]} : vector<18x18x3xbf16> to vector<16x16x3xbf16>
    %30 = vector.shape_cast %29 : vector<16x16x3xbf16> to vector<256x3xbf16>
    %31 = tpu.concatenate %26, %28, %30 in 1 : vector<256x3xbf16>, vector<256x3xbf16>, vector<256x3xbf16> -> vector<256x9xbf16>
    %32 = tpu.concatenate %17, %24, %31 in 1 : vector<256x9xbf16>, vector<256x9xbf16>, vector<256x9xbf16> -> vector<256x27xbf16>
    %c0_3 = arith.constant 0 : index
    %c0_4 = arith.constant 0 : index
    %c0_5 = arith.constant 0 : index
    %33 = vector.load %arg2[%c0_3, %c0_4, %c0_5] : memref<1x27x64xbf16, #tpu.memory_space<vmem>>, vector<1x27x64xbf16>
    %34 = vector.shape_cast %33 : vector<1x27x64xbf16> to vector<27x64xbf16>
    %cst = arith.constant dense<0.000000e+00> : vector<256x64xf32>
    %35 = tpu.matmul %32, %34, %cst {dimension_numbers = #tpu.dot_dimension_numbers<[1], [0], [0], [1], [0, 0, 1, 1], [], []>} : vector<256x27xbf16>, vector<27x64xbf16>, vector<256x64xf32> -> vector<256x64xf32>
    %c0_6 = arith.constant 0 : index
    %c0_7 = arith.constant 0 : index
    %36 = vector.load %arg5[%c0_6, %c0_7] : memref<256x64xf32, #tpu.memory_space<vmem>>, vector<256x64xf32>
    tpu.vector_store %arg5[%c0_6, %c0_7], %35 {strides = array<i32>} : memref<256x64xf32, #tpu.memory_space<vmem>>, vector<256x64xf32>,
    %c0_8 = arith.constant 0 : index
    %c0_9 = arith.constant 0 : index
    %37 = vector.load %arg5[%c0_8, %c0_9] : memref<256x64xf32, #tpu.memory_space<vmem>>, vector<256x64xf32>
    %c0_10 = arith.constant 0 : index
    %c0_11 = arith.constant 0 : index
    %38 = vector.load %arg3[%c0_10, %c0_11] : memref<1x64xf32, #tpu.memory_space<vmem>>, vector<1x64xf32>
    %39 = vector.shape_cast %38 : vector<1x64xf32> to vector<64xf32>
    %40 = vector.shape_cast %39 : vector<64xf32> to vector<1x64xf32>
    %41 = vector.broadcast %40 : vector<1x64xf32> to vector<256x64xf32>
    %42 = arith.addf %37, %41 : vector<256x64xf32>
    %cst_12 = arith.constant 0.000000e+00 : f32
    %43 = vector.broadcast %cst_12 : f32 to vector<256x64xf32>
    %44 = arith.maximumf %42, %43 : vector<256x64xf32>
    %45 = vector.shape_cast %44 : vector<256x64xf32> to vector<16x16x64xf32>
    %46 = arith.truncf %45 : vector<16x16x64xf32> to vector<16x16x64xbf16>
    %c0_13 = arith.constant 0 : index
    %c0_14 = arith.constant 0 : index
    %c0_15 = arith.constant 0 : index
    %c0_16 = arith.constant 0 : index
    %47 = vector.load %arg4[%c0_13, %c0_14, %c0_15, %c0_16] : memref<1x16x16x64xbf16, #tpu.memory_space<vmem>>, vector<1x16x16x64xbf16>
    %48 = vector.shape_cast %47 : vector<1x16x16x64xbf16> to vector<16x16x64xbf16>
    %49 = vector.shape_cast %46 : vector<16x16x64xbf16> to vector<1x16x16x64xbf16>
    tpu.vector_store %arg4[%c0_13, %c0_14, %c0_15, %c0_16], %49 {strides = array<i32>} : memref<1x16x16x64xbf16, #tpu.memory_space<vmem>>, vector<1x16x16x64xbf16>,
    return
  }
  func.func @transform_0(%arg0: i32) -> (i32, i32, i32, i32) {
    %c0_i32 = arith.constant 0 : i32
    %c0_i32_0 = arith.constant 0 : i32
    %c0_i32_1 = arith.constant 0 : i32
    %c0_i32_2 = arith.constant 0 : i32
    return %arg0, %c0_i32, %c0_i32_0, %c0_i32_1 : i32, i32, i32, i32
  }
  func.func @transform_1(%arg0: i32) -> (i32, i32, i32) {
    %c0_i32 = arith.constant 0 : i32
    %c0_i32_0 = arith.constant 0 : i32
    %c0_i32_1 = arith.constant 0 : i32
    %c0_i32_2 = arith.constant 0 : i32
    return %c0_i32, %c0_i32_0, %c0_i32_1 : i32, i32, i32
  }
  func.func @transform_2(%arg0: i32) -> (i32, i32) {
    %c0_i32 = arith.constant 0 : i32
    %c0_i32_0 = arith.constant 0 : i32
    %c0_i32_1 = arith.constant 0 : i32
    return %c0_i32, %c0_i32_0 : i32, i32
  }
  func.func @transform_3(%arg0: i32) -> (i32, i32, i32, i32) {
    %c0_i32 = arith.constant 0 : i32
    %c0_i32_0 = arith.constant 0 : i32
    %c0_i32_1 = arith.constant 0 : i32
    %c0_i32_2 = arith.constant 0 : i32
    return %arg0, %c0_i32, %c0_i32_0, %c0_i32_1 : i32, i32, i32, i32
  }
}

</mosaic_0001>

<bundles_post_ra>
// kernel: tpu_custom_call.1
= control target key start
LH: loop header
LB: loop body
LE: loop exit
PB: predicated region body
PF: predicated region fallthrough
CT: control target
= control target key end

     0   :  { %8 = vsyncpa [#allocation4], 0  ;;  %s2682_s0 = inlined_call_operand.vmem [shape: bf16[2,16,16,3], index: 0, kind: input, shape index: {}]   ;;  %s2683_s1 = inlined_call_operand.vmem [shape: bf16[1,27,64], index: 1, kind: input, shape index: {}]   ;;  %s2684_s2 = inlined_call_operand.vmem [shape: f32[1,64], index: 2, kind: input, shape index: {}]   ;;  %s2685_s3 = inlined_call_operand.hbm [shape: bf16[2,16,16,64], index: 3, kind: output, shape index: {}]  }
   0x1   :  { %10 = vsyncpa [#allocation4 + $0x1], 0  ;;  %s1966_s12 = smov 0   ;;  %s1968_s13 = smov 0  }
   0x2   :  { %s1970_s14 = smov 0   ;;  %s1972_s15 = smov 0  }
   0x3 LB: > { %s1987_s16 = sadd.s32 4294967295, %s1935_s15   ;;  %s1637_s17 = sadd.s32 4294967294, %s1935_s15   ;;  %s1935_s15 = sphi %s1972_s15, %s2693_s15   ;;  %s1931_s14 = sphi %s1970_s14, %s2692_s14   ;;  %s1927_s13 = sphi %s1968_s13, %s2691_s13   ;;  %s1923_s12 = sphi %s1966_s12, %s2690_s12  }
   0x4   : > { %s1991_s18 = sadd.s32 1, %s1935_s15   ;;  %s91_s19 = sadd.s32 1, %s1931_s14 }
   0x5   : > { %s88_s20 = ssub.s32 %s1935_s15, %s1991_s18  ;;  %p101_p0 = scmp.ne.s32.totalorder %s1931_s14, %s1927_s13 }
   0x6   : > { %p89_p1 = scmp.eq.s32.totalorder %s88_s20, 0  ;;  %p102_p2 = scmp.eq.s32.totalorder %s1987_s16, 1 }
   0x7   : > { %p107_p3 = scmp.ne.s32.totalorder %s1927_s13, %s1923_s12  ;;  %p108_p4 = scmp.eq.s32.totalorder %s1637_s17, 1 }
   0x8   : > { %s2002_s21 = scalar_select %p89_p1, %s1931_s14, %s91_s19  }
   0x9   : > { %p2004_p5 = por %p102_p2, %p101_p0  ;;  %p2008_p6 = por %p108_p4, %p107_p3 }
   0xa   : > { %p1640_p7 = scmp.ge.s32.totalorder %s1935_s15, 1  ;;  %p140_p8 = scmp.lt.s32.totalorder %s1935_s15, 3 }
   0xc   : > { %p141_p9 = pnand %p1640_p7, %p140_p8 }
   0xd   : > { %p164_p10 = scmp.lt.s32.totalorder (!%p141_p9), %s1987_s16, 1  ;;  %vm435_vm0 = vcmask (!%p141_p9), 1040384   ;;  %vm436_vm1 = vsmask.f32 (!%p141_p9), 256  ;;  %vm697_vm2 = vcmask (!%p141_p9), 1046528   ;;  %s1937_s29 = smov (!%p141_p9), 6  }
   0xe   : > { %144 = sbr.rel (%p141_p9) target bundleno = 594 (0x252), region = 32  ;;  %vm2023_vm3 = vmand (!%p141_p9), %vm435_vm0, %vm436_vm1  ;;  %vm472_vm4 = vsmask.f32 (!%p141_p9), 7424  ;;  %s1938_s30 = smov (!%p141_p9), 3   ;;  %vm1096_vm5 = vcmask (!%p141_p9), 1044480   ;;  %vm810_vm6 = vcmask (!%p141_p9), 23552  }
   0xf   : > { %vm1097_vm7 = vcmask (!%p141_p9), 1045504   ;;  %vm843_vm8 = vcmask (!%p141_p9), 48128   ;;  %s1941_s8 = smov (!%p141_p9), 9   ;;  %s1942_s9 = smov (!%p141_p9), 18   ;;  %vm982_vm9 = vcmask (!%p141_p9), 72704   ;;  %vm1015_vm10 = vcmask (!%p141_p9), 146432  }
  0x10   : > { %vm1063_vm11 = vcmask (!%p141_p9), 220160   ;;  %vm1264_vm12 = vcmask (!%p141_p9), 523264   ;;  %s161_s10 = sand.u32 (!%p141_p9), 1, %s1927_s13   ;;  %vm1528_vm13 = vcmask (!%p141_p9), 519168  }
  0x11   : > { %s1641_s19 = sshll.u32 (!%p141_p9), %s161_s10, 7 }
  0x12   : > { %s2514_s20 = scalar_lea.vmem (!%p141_p9), [#allocation3], %s1641_s19 }
  0x15   : > { %s165_s24 = scalar_select %p164_p10, %s1987_s16, 1 }
  0x17   : > { %s1716_s25 = sshll.u32 %s165_s24, 7  ;;  %s1749_s24 = sshll.u32 %s1987_s16, 11 }
  0x18   : > { %s2019_s28 = scalar_lea.vmem %s2682_s0, %s1716_s25  ;;  %s1575_s25 = sshll.u32 %s2514_s20, 4  ;;  %s2629_s25 = int_to_ptr.vmem [resolvable:$true] %s1575_s25 }
  0x19   : > { %v1855_v0 = vld [vmem:[%s2019_s28 + $0x40] sm:$0xff]   ;;  %v1857_v7 = vld [vmem:[%s2019_s28 + $0x48] sm:$0xff]   ;;  %v1859_v10 = vld [vmem:[%s2019_s28 + $0x50] sm:$0xff]   ;;  %s2627_s27 = scalar_lea.hbm %s2685_s3, %s1749_s24 }
  0x1a   : > { %v1856_v1 = vld [vmem:[%s2019_s28] sm:$0xff]   ;;  %v346_v2 = vshrl.u32 %v1855_v0, 16  ;;  %v349_v3 = vshll.u32 %v1855_v0, 16  ;;  %v1858_v8 = vld [vmem:[%s2019_s28 + $0x8] sm:$0xff]   ;;  %v353_v12 = vshrl.u32 %v1857_v7, 16  ;;  %v356_v13 = vshll.u32 %v1857_v7, 16 }
  0x1b   : > { %v290_v5 = vshrl.u32 %v1856_v1, 16  ;;  %v293_v6 = vshll.u32 %v1856_v1, 16  ;;  %v297_v14 = vshrl.u32 %v1858_v8, 16  ;;  %v300_v17 = vshll.u32 %v1858_v8, 16  ;;  %v1860_v31 = vld [vmem:[%s2019_s28 + $0x10] sm:$0xff]  }
  0x1c   : > { %v348_v9 = vrot.slane %v346_v2, 7  ;;  %v360_v18 = vshrl.u32 %v1859_v10, 16  ;;  %v355_v22 = vrot.slane %v353_v12, 7  ;;  %v363_v39 = vshll.u32 %v1859_v10, 16 }
  0x1d   : > { %v292_v11 = vrot.slane %v290_v5, 7  ;;  %v299_v25 = vrot.slane %v297_v14, 7  ;;  %v304_v47 = vshrl.u32 %v1860_v31, 16  ;;  %v307_v49 = vshll.u32 %v1860_v31, 16 }
  0x1e   : > { %v351_v15 = vor.u32 %v349_v3, %v348_v9  ;;  %v2032_v16 = vsel %vm2023_vm3, %v348_v9, 0  ;;  %v362_v26 = vrot.slane %v360_v18, 7  ;;  %v358_v29 = vor.u32 %v356_v13, %v355_v22  ;;  %v1861_v9 = vld [vmem:[%s2019_s28 + $0x58] sm:$0xff]  }
  0x1f   : > { %v726_v19 = vrot.slane %v2032_v16, 1  ;;  %v295_v20 = vor.u32 %v293_v6, %v292_v11  ;;  %v456_v21 = vsel %vm2023_vm3, %v292_v11, 0  ;;  %v465_v30 = vsel %vm2023_vm3, %v355_v22, 0 }
  0x20   : > { %v2039_v23 = vsel %vm2023_vm3, 0, %v351_v15  ;;  %v702_v24 = vrot.slane %v456_v21, 1  ;;  %v729_v33 = vrot.slane %v465_v30, 1  ;;  %v302_v34 = vor.u32 %v300_v17, %v299_v25 }
  0x21   : > { %v725_v27 = vrot.slane %v2039_v23, 1  ;;  %v2044_v28 = vsel %vm2023_vm3, 0, %v295_v20  ;;  %v457_v35 = vsel %vm2023_vm3, %v299_v25, 0  ;;  %v2055_v37 = vsel %vm2023_vm3, 0, %v358_v29 }
  0x22   : > { %v701_v32 = vrot.slane %v2044_v28, 1  ;;  %v705_v38 = vrot.slane %v457_v35, 1  ;;  %v728_v41 = vrot.slane %v2055_v37, 1  ;;  %v2062_v42 = vsel %vm2023_vm3, 0, %v302_v34 }
  0x23   : > { %v727_v36 = vsel %vm697_vm2, %v725_v27, %v726_v19  ;;  %v2066_v43 = vsel %vm2023_vm3, %v362_v26, 0  ;;  %v704_v44 = vrot.slane %v2062_v42, 1  ;;  %v365_v45 = vor.u32 %v363_v39, %v362_v26  ;;  %v1862_v19 = vld [vmem:[%s2019_s28 + $0x18] sm:$0xff]  }
  0x24   : > { %796 = vrot.lane.b32.xlu1 %v727_v36, %s1937_s29  ;;  %v703_v40 = vsel %vm697_vm2, %v701_v32, %v702_v24  ;;  %v732_v46 = vrot.slane %v2066_v43, 1  ;;  %v730_v48 = vsel %vm697_vm2, %v728_v41, %v729_v33  ;;  %v498_v50 = vshrl.u32 %v2062_v42, 16 }
  0x25   : > { %780 = vrot.lane.b32.xlu0 %v703_v40, %s1937_s29  ;;  %v500_v51 = vshll.u32 %v2062_v42, 16  ;;  %v706_v52 = vsel %vm697_vm2, %v704_v44, %v705_v38  ;;  %v2077_v53 = vsel %vm2023_vm3, 0, %v365_v45  ;;  %v306_v54 = vrot.slane %v304_v47, 7  ;;  %v1864_v45 = vld [vmem:[%s2019_s28 + $0x20] sm:$0xff]  }
  0x26   : > { %v505_v55 = vshll.u32 %v457_v35, 16  ;;  %v731_v56 = vrot.slane %v2077_v53, 1  ;;  %v486_v58 = vshrl.u32 %v2044_v28, 16  ;;  %v488_v59 = vshll.u32 %v2044_v28, 16 }
  0x27   : > { %v502_v57 = vrot.slane %v500_v51, 1  ;;  %v309_v60 = vor.u32 %v307_v49, %v306_v54  ;;  %v458_v61 = vsel %vm2023_vm3, %v306_v54, 0  ;;  %v493_v63 = vshll.u32 %v456_v21, 16 }
  0x28   : > { %798 = vrot.lane.b32.xlu1 %v730_v48, %s1937_s29  ;;  %v507_v62 = vrot.slane %v505_v55, 1  ;;  %v733_v0 = vsel %vm697_vm2, %v731_v56, %v732_v46  ;;  %v708_v1 = vrot.slane %v458_v61, 1  ;;  %v490_v3 = vrot.slane %v488_v59, 1 }
  0x29   : > { %782 = vrot.lane.b32.xlu0 %v706_v52, %s1937_s29  ;;  %v503_v2 = vor.u32 %v502_v57, %v498_v50  ;;  %v2089_v5 = vsel %vm2023_vm3, 0, %v309_v60  ;;  %v495_v6 = vrot.slane %v493_v63, 1  ;;  %v594_v7 = vshrl.u32 %v2055_v37, 16 }
  0x2a   : > { %v596_v8 = vshll.u32 %v2055_v37, 16  ;;  %v707_v10 = vrot.slane %v2089_v5, 1  ;;  %v491_v12 = vor.u32 %v490_v3, %v486_v58  ;;  %v601_v13 = vshll.u32 %v465_v30, 16  ;;  %v1863_v30 = vld [vmem:[%s2019_s28 + $0x60] sm:$0xff]  }
  0x2b   : > { %v508_v11 = vsel %vm472_vm4, %v503_v2, %v507_v62  ;;  %v582_v15 = vshrl.u32 %v2039_v23, 16  ;;  %v584_v17 = vshll.u32 %v2039_v23, 16  ;;  %v589_v18 = vshll.u32 %v2032_v16, 16 }
  0x2c   : > { %800 = vrot.lane.b32.xlu1 %v733_v0, %s1937_s29  ;;  %v598_v14 = vrot.slane %v596_v8, 1  ;;  %v709_v20 = vsel %vm697_vm2, %v707_v10, %v708_v1  ;;  %v496_v21 = vsel %vm472_vm4, %v491_v12, %v495_v6  ;;  %v603_v22 = vrot.slane %v601_v13, 1 }
  0x2d   : > { %v606_v24 = vshrl.u32 %v2077_v53, 16  ;;  %784 = vrot.lane.b32.xlu0 %v709_v20, %s1937_s29  ;;  %v586_v26 = vrot.slane %v584_v17, 1  ;;  %v591_v27 = vrot.slane %v589_v18, 1  ;;  %v608_v29 = vshll.u32 %v2077_v53, 16 }
  0x2e   : > { %v599_v25 = vor.u32 %v598_v14, %v594_v7  ;;  %v613_v16 = vshll.u32 %v2066_v43, 16  ;;  %v510_v31 = vshrl.u32 %v2089_v5, 16  ;;  %v512_v32 = vshll.u32 %v2089_v5, 16 }
  0x2f   : > { %v517_v33 = vshll.u32 %v458_v61, 16  ;;  %v587_v35 = vor.u32 %v586_v26, %v582_v15  ;;  %v610_v36 = vrot.slane %v608_v29, 1  ;;  %v367_v38 = vshrl.u32 %v1861_v9, 16 }
  0x30   : > { %750 = vrot.lane.b32.xlu1 %v508_v11, %s1938_s30  ;;  %v604_v34 = vsel %vm472_vm4, %v599_v25, %v603_v22  ;;  %v615_v39 = vrot.slane %v613_v16, 1  ;;  %v514_v40 = vrot.slane %v512_v32, 1  ;;  %v370_v44 = vshll.u32 %v1861_v9, 16 }
  0x31   : > { %v519_v41 = vrot.slane %v517_v33, 1  ;;  %748 = vrot.lane.b32.xlu0 %v496_v21, %s1938_s30  ;;  %v592_v46 = vsel %vm472_vm4, %v587_v35, %v591_v27  ;;  %v611_v43 = vor.u32 %v610_v36, %v606_v24  ;;  %v369_v47 = vrot.slane %v367_v38, 7  ;;  %v1865_v35 = vld [vmem:[%s2019_s28 + $0x68] sm:$0xff]  }
  0x32   : > { %v311_v48 = vshrl.u32 %v1862_v19, 16  ;;  %v515_v49 = vor.u32 %v514_v40, %v510_v31  ;;  %v314_v50 = vshll.u32 %v1862_v19, 16  ;;  %v374_v51 = vshrl.u32 %v1863_v30, 16 }
  0x33   : > { %v377_v52 = vshll.u32 %v1863_v30, 16  ;;  %v616_v54 = vsel %vm472_vm4, %v611_v43, %v615_v39  ;;  %v372_v55 = vor.u32 %v370_v44, %v369_v47  ;;  %v467_v56 = vsel %vm2023_vm3, %v369_v47, 0  ;;  %v1867_v47 = vld [vmem:[%s2019_s28 + $0x70] sm:$0xff]  }
  0x34   : > { %766 = vrot.lane.b32.xlu1 %v604_v34, %s1938_s30  ;;  %v313_v57 = vrot.slane %v311_v48, 7  ;;  %v520_v58 = vsel %vm472_vm4, %v515_v49, %v519_v41  ;;  %v625_v59 = vshll.u32 %v467_v56, 16  ;;  %v376_v60 = vrot.slane %v374_v51, 7  ;;  %v1866_v41 = vld [vmem:[%s2019_s28 + $0x28] sm:$0xff]  }
  0x35   : > { %v318_v61 = vshrl.u32 %v1864_v45, 16  ;;  %764 = vrot.lane.b32.xlu0 %v592_v46, %s1938_s30  ;;  %v2123_v62 = vsel %vm2023_vm3, 0, %v372_v55  ;;  %v321_v1 = vshll.u32 %v1864_v45, 16  ;;  %v1939_v30 = vmov 0  }
  0x36   : > { %v316_v63 = vor.u32 %v314_v50, %v313_v57  ;;  %v459_v0 = vsel %vm2023_vm3, %v313_v57, 0  ;;  %v618_v2 = vshrl.u32 %v2123_v62, 16  ;;  %v620_v3 = vshll.u32 %v2123_v62, 16 }
  0x37   : > { %v627_v6 = vrot.slane %v625_v59, 1  ;;  %v529_v7 = vshll.u32 %v459_v0, 16  ;;  %v379_v9 = vor.u32 %v377_v52, %v376_v60  ;;  %v468_v10 = vsel %vm2023_vm3, %v376_v60, 0  ;;  %v1868_v52 = vld [vmem:[%s2019_s28 + $0x30] sm:$0xff]  }
  0x38   : > { %768 = vrot.lane.b32.xlu1 %v616_v54, %s1938_s30  ;;  %v2132_v8 = vsel %vm2023_vm3, 0, %v316_v63  ;;  %v320_v11 = vrot.slane %v318_v61, 7  ;;  %v622_v12 = vrot.slane %v620_v3, 1  ;;  %v637_v18 = vshll.u32 %v468_v10, 16 }
  0x39   : > { %v522_v13 = vshrl.u32 %v2132_v8, 16  ;;  %v524_v14 = vshll.u32 %v2132_v8, 16  ;;  %v531_v15 = vrot.slane %v529_v7, 1  ;;  %752 = vrot.lane.b32.xlu0 %v520_v58, %s1938_s30  ;;  %v2141_v17 = vsel %vm2023_vm3, 0, %v379_v9 }
  0x3a   : > { %v323_v19 = vor.u32 %v321_v1, %v320_v11  ;;  %v2145_v20 = vsel %vm2023_vm3, %v320_v11, 0  ;;  %v623_v21 = vor.u32 %v622_v12, %v618_v2  ;;  %v630_v24 = vshrl.u32 %v2141_v17, 16 }
  0x3b   : > { %v526_v22 = vrot.slane %v524_v14, 1  ;;  %v632_v25 = vshll.u32 %v2141_v17, 16  ;;  %v541_v27 = vshll.u32 %v2145_v20, 16  ;;  %v734_v29 = vrot.slane %v2123_v62, 1 }
  0x3c   : > { %v2151_v26 = vsel %vm2023_vm3, 0, %v323_v19  ;;  %v2155_v16 = vrot.slane %v1939_v30, 7  ;;  %v628_v31 = vsel %vm472_vm4, %v623_v21, %v627_v6  ;;  %v639_v34 = vrot.slane %v637_v18, 1 }
  0x3d   : > { %v527_v32 = vor.u32 %v526_v22, %v522_v13  ;;  %v634_v33 = vrot.slane %v632_v25, 1  ;;  %770 = vrot.lane.b32.xlu1 %v628_v31, %s1938_s30  ;;  %v534_v36 = vshrl.u32 %v2151_v26, 16  ;;  %v536_v38 = vshll.u32 %v2151_v26, 16 }
  0x3e   : > { %v735_v39 = vrot.slane %v467_v56, 1  ;;  %v710_v40 = vrot.slane %v2132_v8, 1  ;;  %v711_v46 = vrot.slane %v459_v0, 1  ;;  %v737_v43 = vrot.slane %v2141_v17, 1 }
  0x3f   : > { %v532_v44 = vsel %vm472_vm4, %v527_v32, %v531_v15  ;;  %v635_v45 = vor.u32 %v634_v33, %v630_v24  ;;  %v538_v48 = vrot.slane %v536_v38, 1  ;;  %v543_v49 = vrot.slane %v541_v27, 1 }
  0x40   : > { %754 = vrot.lane.b32.xlu0 %v532_v44, %s1938_s30  ;;  %v736_v50 = vsel %vm697_vm2, %v734_v29, %v735_v39  ;;  %v738_v51 = vrot.slane %v468_v10, 1  ;;  %v712_v55 = vsel %vm697_vm2, %v710_v40, %v711_v46  ;;  %v713_v56 = vrot.slane %v2151_v26, 1 }
  0x41   : > { %v640_v54 = vsel %vm472_vm4, %v635_v45, %v639_v34  ;;  %v381_v57 = vshrl.u32 %v1865_v35, 16  ;;  %v539_v58 = vor.u32 %v538_v48, %v534_v36  ;;  %v714_v59 = vrot.slane %v2145_v20, 1 }
  0x42   : > { %772 = vrot.lane.b32.xlu1 %v640_v54, %s1938_s30  ;;  %v384_v60 = vshll.u32 %v1865_v35, 16  ;;  %v325_v61 = vshrl.u32 %v1866_v41, 16  ;;  %v739_v63 = vsel %vm697_vm2, %v737_v43, %v738_v51  ;;  %v328_v1 = vshll.u32 %v1866_v41, 16  ;;  %v1869_v51 = vld [vmem:[%s2019_s28 + $0x78] sm:$0xff]  }
  0x43   : > { %v383_v0 = vrot.slane %v381_v57, 7  ;;  %v388_v2 = vshrl.u32 %v1867_v47, 16  ;;  %v544_v3 = vsel %vm472_vm4, %v539_v58, %v543_v49  ;;  %v391_v7 = vshll.u32 %v1867_v47, 16  ;;  %v1870_v57 = vld [vmem:[%s2019_s28 + $0x38] sm:$0xff]   ;;  %s2641_s28 = scalar_lea.sflag [#allocation4], %s161_s10 }
  0x44   : > { %v327_v6 = vrot.slane %v325_v61, 7  ;;  %v332_v9 = vshrl.u32 %v1868_v52, 16  ;;  %756 = vrot.lane.b32.xlu0 %v544_v3, %s1938_s30  ;;  %v335_v13 = vshll.u32 %v1868_v52, 16  ;;  %v715_v25 = vsel %vm697_vm2, %v713_v56, %v714_v59 }
  0x45   : > { %v386_v10 = vor.u32 %v384_v60, %v383_v0  ;;  %v469_v11 = vsel %vm2023_vm3, %v383_v0, 0  ;;  %v390_v12 = vrot.slane %v388_v2, 7 }
  0x46   : > { %802 = vrot.lane.b32.xlu1 %v736_v50, %s1937_s29  ;;  %v649_v14 = vshll.u32 %v469_v11, 16  ;;  %v330_v15 = vor.u32 %v328_v1, %v327_v6  ;;  %v2183_v18 = vsel %vm2023_vm3, %v327_v6, 0  ;;  %v334_v19 = vrot.slane %v332_v9, 7 }
  0x47   : > { %v2187_v20 = vsel %vm2023_vm3, 0, %v386_v10  ;;  %v553_v21 = vshll.u32 %v2183_v18, 16  ;;  %v393_v22 = vor.u32 %v391_v7, %v390_v12  ;;  %v2192_v24 = vsel %vm2023_vm3, %v390_v12, 0 }
  0x48   : > { %v642_v27 = vshrl.u32 %v2187_v20, 16  ;;  %v644_v29 = vshll.u32 %v2187_v20, 16  ;;  %v2199_v30 = vsel %vm2023_vm3, 0, %v330_v15  ;;  %786 = vrot.lane.b32.xlu0 %v712_v55, %s1937_s29  ;;  %v651_v31 = vrot.slane %v649_v14, 1 }
  0x49   : > { %v546_v32 = vshrl.u32 %v2199_v30, 16  ;;  %v548_v33 = vshll.u32 %v2199_v30, 16  ;;  %v2206_v34 = vsel %vm2023_vm3, 0, %v393_v22  ;;  %v661_v39 = vshll.u32 %v2192_v24, 16 }
  0x4a   : > { %804 = vrot.lane.b32.xlu1 %v739_v63, %s1937_s29  ;;  %v646_v35 = vrot.slane %v644_v29, 1  ;;  %v654_v36 = vshrl.u32 %v2206_v34, 16  ;;  %v656_v38 = vshll.u32 %v2206_v34, 16  ;;  %v555_v41 = vrot.slane %v553_v21, 1 }
  0x4b   : > { %v550_v40 = vrot.slane %v548_v33, 1  ;;  %v337_v44 = vor.u32 %v335_v13, %v334_v19  ;;  %v462_v45 = vsel %vm2023_vm3, %v334_v19, 0  ;;  %v663_v47 = vrot.slane %v661_v39, 1 }
  0x4c   : > { %v647_v46 = vor.u32 %v646_v35, %v642_v27  ;;  %v658_v43 = vrot.slane %v656_v38, 1  ;;  %v565_v48 = vshll.u32 %v462_v45, 16  ;;  %788 = vrot.lane.b32.xlu0 %v715_v25, %s1937_s29  ;;  %v740_v59 = vrot.slane %v2187_v20, 1 }
  0x4d   : > { %v551_v49 = vor.u32 %v550_v40, %v546_v32  ;;  %v2217_v50 = vsel %vm2023_vm3, 0, %v337_v44  ;;  %v741_v60 = vrot.slane %v469_v11, 1  ;;  %v2231_v1 = vsel %vm2023_vm3, 0, %v2155_v16 }
  0x4e   : > { %v652_v52 = vsel %vm472_vm4, %v647_v46, %v651_v31  ;;  %v659_v54 = vor.u32 %v658_v43, %v654_v36  ;;  %v558_v55 = vshrl.u32 %v2217_v50, 16  ;;  %v560_v56 = vshll.u32 %v2217_v50, 16 }
  0x4f   : > { %774 = vrot.lane.b32.xlu1 %v652_v52, %s1938_s30  ;;  %v556_v58 = vsel %vm472_vm4, %v551_v49, %v555_v41  ;;  %v567_v0 = vrot.slane %v565_v48, 1  ;;  %v716_v2 = vrot.slane %v2199_v30, 1  ;;  %v717_v3 = vrot.slane %v2183_v18, 1 }
  0x50   : > { %v664_v61 = vsel %vm472_vm4, %v659_v54, %v663_v47  ;;  %v562_v63 = vrot.slane %v560_v56, 1  ;;  %758 = vrot.lane.b32.xlu0 %v556_v58, %s1938_s30  ;;  %v395_v6 = vshrl.u32 %v1869_v51, 16  ;;  %v398_v9 = vshll.u32 %v1869_v51, 16 }
  0x51   : > { %v339_v10 = vshrl.u32 %v1870_v57, 16  ;;  %v455_v11 = vsel %vm2023_vm3, %v2155_v16, 0  ;;  %v742_v12 = vsel %vm697_vm2, %v740_v59, %v741_v60  ;;  %v342_v14 = vshll.u32 %v1870_v57, 16 }
  0x52   : > { %v563_v7 = vor.u32 %v562_v63, %v558_v55  ;;  %v397_v13 = vrot.slane %v395_v6, 7  ;;  %v476_v15 = vshll.u32 %v2231_v1, 16  ;;  %v743_v18 = vrot.slane %v2206_v34, 1 }
  0x53   : > { %776 = vrot.lane.b32.xlu1 %v664_v61, %s1938_s30  ;;  %v744_v21 = vrot.slane %v2192_v24, 1  ;;  %v341_v22 = vrot.slane %v339_v10, 7  ;;  %v718_v25 = vsel %vm697_vm2, %v716_v2, %v717_v3  ;;  %v719_v16 = vrot.slane %v2217_v50, 1 }
  0x54   : > { %v568_v19 = vsel %vm472_vm4, %v563_v7, %v567_v0  ;;  %v400_v27 = vor.u32 %v398_v9, %v397_v13  ;;  %v471_v29 = vsel %vm2023_vm3, %v397_v13, 0  ;;  %v720_v31 = vrot.slane %v462_v45, 1 }
  0x55   : > { %760 = vrot.lane.b32.xlu0 %v568_v19, %s1938_s30  ;;  %v884_v32 = vshll.u32 %v471_v29, 16  ;;  %v344_v33 = vor.u32 %v342_v14, %v341_v22  ;;  %v463_v35 = vsel %vm2023_vm3, %v341_v22, 0  ;;  %v745_v38 = vsel %vm697_vm2, %v743_v18, %v744_v21  ;;  %v1871_v19 = vld [vmem:[%s2683_s1] sm:$0xff]   ;;  %v1872_v22 = vld [vmem:[%s2683_s1 + $0x8] sm:$0x3f]  }
  0x56   : > { %v2255_v24 = vsel %vm2023_vm3, 0, %v400_v27  ;;  %v577_v36 = vshll.u32 %v463_v35, 16  ;;  %v474_v46 = vshrl.u32 %v2231_v1, 16  ;;  %v481_v43 = vshll.u32 %v455_v11, 16  ;;  %1768 = vmatprep.subr.bf16.mxu0 %v1871_v19  ;;  %1804 = vmatprep.subr.bf16.mxu1 %v1871_v19 }
  0x57   : > { %806 = vrot.lane.b32.xlu1 %v742_v12, %s1937_s29  ;;  %v877_v39 = vshrl.u32 %v2255_v24, 16  ;;  %v879_v40 = vshll.u32 %v2255_v24, 16  ;;  %v2262_v41 = vsel %vm2023_vm3, 0, %v344_v33  ;;  %v721_v47 = vsel %vm697_vm2, %v719_v16, %v720_v31  ;;  %1769 = vmatpush3.bf16.msra.mxu0 %v1871_v19 }
  0x58   : > { %v570_v44 = vshrl.u32 %v2262_v41, 16  ;;  %v572_v45 = vshll.u32 %v2262_v41, 16  ;;  %v886_v49 = vrot.slane %v884_v32, 1  ;;  %v478_v51 = vrot.slane %v476_v15, 1  ;;  %1806 = vmatpush3.bf16.msra.mxu1 %v1871_v19 }
  0x59   : > { %790 = vrot.lane.b32.xlu0 %v718_v25, %s1937_s29  ;;  %v881_v48 = vrot.slane %v879_v40, 1  ;;  %v579_v4 = vrot.slane %v577_v36, 1  ;;  %v722_v55 = vrot.slane %v2262_v41, 1  ;;  %v723_v56 = vrot.slane %v463_v35, 1 }
  0x5a   : > { %v574_v52 = vrot.slane %v572_v45, 1  ;;  %v479_v59 = vor.u32 %v478_v51, %v474_v46  ;;  %v483_v60 = vrot.slane %v481_v43, 1  ;;  %v698_v0 = vrot.slane %v2231_v1, 1 }
  0x5b   : > { %808 = vrot.lane.b32.xlu1 %v745_v38, %s1937_s29  ;;  %v882_v54 = vor.u32 %v881_v48, %v877_v39  ;;  %v724_v63 = vsel %vm697_vm2, %v722_v55, %v723_v56  ;;  %v699_v2 = vrot.slane %v455_v11, 1  ;;  %v890_v6 = vrot.slane %v2255_v24, 1 }
  0x5c   : > { %v575_v57 = vor.u32 %v574_v52, %v570_v44  ;;  %v484_v3 = vsel %vm472_vm4, %v479_v59, %v483_v60  ;;  %v891_v7 = vrot.slane %v471_v29, 1  ;;  %v1940_v25 = vmov 65535  }
  0x5d   : > { %792 = vrot.lane.b32.xlu0 %v721_v47, %s1937_s29  ;;  %v887_v58 = vsel %vm472_vm4, %v882_v54, %v886_v49  ;;  %v700_v9 = vsel %vm697_vm2, %v698_v0, %v699_v2  ;;  %v1098_v16 = vsel %vm1096_vm5, 4294967295, %v1940_v25 }
  0x5e   : > { %v580_v61 = vsel %vm472_vm4, %v575_v57, %v579_v4  ;;  %v892_v10 = vsel %vm697_vm2, %v890_v6, %v891_v7  ;;  %v1099_v27 = vsel %vm1097_vm7, %v1098_v16, 0 }
  0x5f   : > { %893 = vrot.lane.b32.xlu1 %v887_v58, %s1938_s30  ;;  %v1101_v31 = vand.u32 %v1872_v22, %v1099_v27 }
  0x61   : > { %762 = vrot.lane.b32.xlu0 %v580_v61, %s1938_s30  ;;  %1770 = vmatprep.subr.bf16.mxu0 %v1101_v31 }
  0x62   : > { %1805 = vmatprep.subr.bf16.mxu1 %v1101_v31  ;;  %1771 = vmatpush3.bf16.msra.mxu0 %v1101_v31 }
  0x63   : > { %794 = vrot.lane.b32.xlu1 %v724_v63, %s1937_s29  ;;  %1807 = vmatpush3.bf16.msra.mxu1 %v1101_v31 }
  0x65   : > { %746 = vrot.lane.b32.xlu0 %v484_v3, %s1938_s30  ;;  %s1943_s30 = smov [#allocation3]  }
  0x66   : > { %s1877_s4 = sshll.u32 %s1943_s30, 4  ;;  %s1878_s4 = int_to_ptr.vmem [resolvable:$false] %s1877_s4 }
  0x67   : > { %778 = vrot.lane.b32.xlu1 %v700_v9, %s1937_s29  ;;  %s1879_s5 = scalar_lea.vmem %s1878_s4, 4096  ;;  %p1880_p0 = scmp.lt.s32.totalorder %s2629_s25, %s1878_s4 }
  0x69   : > { %895 = vrot.lane.b32.xlu0 %v892_v10, %s1937_s29  ;;  %s1873_s29 = scalar_lea.vmem %s2629_s25, 2048 }
  0x6a   : > { %p1874_p11 = scmp.ne.s32.totalorder %s2629_s25, %s1873_s29  ;;  %p1881_p1 = scmp.lt.s32.totalorder %s1879_s5, %s1873_s29 }
  0x6c   : > { %p1875_p12 = pnand %p1874_p11, %p2004_p5  ;;  %p1882_p2 = por %p1881_p1, %p1880_p0 }
  0x6e   : > { %p1876_p13 = pneg %p1875_p12 }
  0x70   : > { %p1883_p3 = pnand %p1882_p2, %p1876_p13 }
  0x96   : > { %v797_v11 = vpop.permute.xlu1 %796 }
  0x97   : > { %v781_v12 = vpop.permute.xlu0 %780 }
  0x9a   : > { %v799_v13 = vpop.permute.xlu1 %798 }
  0x9b   : > { %v783_v14 = vpop.permute.xlu0 %782 }
  0x9e   : > { %v801_v15 = vpop.permute.xlu1 %800 }
  0x9f   : > { %v785_v18 = vpop.permute.xlu0 %784 }
  0xa2   : > { %v751_v21 = vpop.permute.xlu1 %750 }
  0xa3   : > { %v749_v29 = vpop.permute.xlu0 %748  ;;  %v816_v36 = vsel %vm810_vm6, %v2062_v42, %v751_v21 }
  0xa4   : > { %v814_v32 = vsel %vm810_vm6, %v2044_v28, %v749_v29  ;;  %v2304_v28 = vsel %vm843_vm8, %v816_v36, %v783_v14 }
  0xa5   : > { %v2295_v35 = vsel %vm843_vm8, %v814_v32, %v781_v12 }
  0xa6   : > { %v767_v33 = vpop.permute.xlu1 %766  ;;  %917 = vrot.lane.b32.xlu0 %v2295_v35, %s1941_s8 }
  0xa7   : > { %v765_v38 = vpop.permute.xlu0 %764  ;;  %v832_v42 = vsel %vm810_vm6, %v2055_v37, %v767_v33 }
  0xa8   : > { %v830_v39 = vsel %vm810_vm6, %v2039_v23, %v765_v38  ;;  %v2316_v46 = vsel %vm843_vm8, %v832_v42, %v799_v13 }
  0xa9   : > { %v2307_v40 = vsel %vm843_vm8, %v830_v39, %v797_v11 }
  0xaa   : > { %v769_v44 = vpop.permute.xlu1 %768  ;;  %919 = vrot.lane.b32.xlu0 %v2304_v28, %s1941_s8  ;;  %933 = vrot.lane.b32.xlu1 %v2307_v40, %s1941_s8 }
  0xab   : > { %v753_v45 = vpop.permute.xlu0 %752  ;;  %v834_v48 = vsel %vm810_vm6, %v2077_v53, %v769_v44 }
  0xac   : > { %v818_v23 = vsel %vm810_vm6, %v2089_v5, %v753_v45  ;;  %v2334_v49 = vsel %vm843_vm8, %v834_v48, %v801_v15 }
  0xad   : > { %v2325_v47 = vsel %vm843_vm8, %v818_v23, %v785_v18 }
  0xae   : > { %950 = vrot.lane.b32.xlu0 %v2304_v28, %s1942_s9  ;;  %935 = vrot.lane.b32.xlu1 %v2316_v46, %s1941_s8 }
  0xaf   : > { %v771_v37 = vpop.permute.xlu1 %770 }
  0xb0   : > { %v836_v56 = vsel %vm810_vm6, %v2123_v62, %v771_v37 }
  0xb2   : > { %v755_v43 = vpop.permute.xlu0 %754  ;;  %966 = vrot.lane.b32.xlu1 %v2316_v46, %s1942_s9  ;;  %952 = vrot.lane.b32.xlu0 %v2325_v47, %s1942_s9 }
  0xb3   : > { %v820_v53 = vsel %vm810_vm6, %v2132_v8, %v755_v43 }
  0xb4   : > { %v773_v5 = vpop.permute.xlu1 %772 }
  0xb5   : > { %v838_v61 = vsel %vm810_vm6, %v2141_v17, %v773_v5 }
  0xb6   : > { %v757_v51 = vpop.permute.xlu0 %756  ;;  %968 = vrot.lane.b32.xlu1 %v2334_v49, %s1942_s9  ;;  %921 = vrot.lane.b32.xlu0 %v2325_v47, %s1941_s8 }
  0xb7   : > { %v822_v59 = vsel %vm810_vm6, %v2151_v26, %v757_v51 }
  0xb8   : > { %v803_v52 = vpop.permute.xlu1 %802 }
  0xb9   : > { %v2352_v57 = vsel %vm843_vm8, %v836_v56, %v803_v52 }
  0xba   : > { %v787_v4 = vpop.permute.xlu0 %786  ;;  %937 = vrot.lane.b32.xlu1 %v2334_v49, %s1941_s8 }
  0xbb   : > { %v2345_v54 = vsel %vm843_vm8, %v820_v53, %v787_v4 }
  0xbc   : > { %v805_v55 = vpop.permute.xlu1 %804  ;;  %923 = vrot.lane.b32.xlu0 %v2345_v54, %s1941_s8 }
  0xbd   : > { %v2370_v0 = vsel %vm843_vm8, %v838_v61, %v805_v55 }
  0xbe   : > { %v789_v58 = vpop.permute.xlu0 %788  ;;  %939 = vrot.lane.b32.xlu1 %v2352_v57, %s1941_s8 }
  0xbf   : > { %v2363_v62 = vsel %vm843_vm8, %v822_v59, %v789_v58 }
  0xc0   : > { %954 = vrot.lane.b32.xlu0 %v2345_v54, %s1942_s9 }
  0xc1   : > { %v775_v8 = vpop.permute.xlu1 %774 }
  0xc2   : > { %v759_v60 = vpop.permute.xlu0 %758  ;;  %970 = vrot.lane.b32.xlu1 %v2352_v57, %s1942_s9  ;;  %v840_v7 = vsel %vm810_vm6, %v2187_v20, %v775_v8 }
  0xc3   : > { %v824_v3 = vsel %vm810_vm6, %v2199_v30, %v759_v60 }
  0xc4   : > { %956 = vrot.lane.b32.xlu0 %v2363_v62, %s1942_s9 }
  0xc5   : > { %v777_v63 = vpop.permute.xlu1 %776 }
  0xc6   : > { %972 = vrot.lane.b32.xlu1 %v2370_v0, %s1942_s9  ;;  %v842_v14 = vsel %vm810_vm6, %v2206_v34, %v777_v63 }
  0xc7   : > { %v761_v2 = vpop.permute.xlu0 %760 }
  0xc8   : > { %925 = vrot.lane.b32.xlu0 %v2363_v62, %s1941_s8  ;;  %v826_v12 = vsel %vm810_vm6, %v2217_v50, %v761_v2 }
  0xc9   : > { %v807_v26 = vpop.permute.xlu1 %806 }
  0xca   : > { %941 = vrot.lane.b32.xlu1 %v2370_v0, %s1941_s8  ;;  %v2388_v10 = vsel %vm843_vm8, %v840_v7, %v807_v26 }
  0xcb   : > { %v791_v6 = vpop.permute.xlu0 %790 }
  0xcc   : > { %v2381_v17 = vsel %vm843_vm8, %v824_v3, %v791_v6 }
  0xcd   : > { %927 = vrot.lane.b32.xlu0 %v2381_v17, %s1941_s8  ;;  %v809_v9 = vpop.permute.xlu1 %808 }
  0xce   : > { %943 = vrot.lane.b32.xlu1 %v2388_v10, %s1941_s8  ;;  %v2406_v19 = vsel %vm843_vm8, %v842_v14, %v809_v9 }
  0xcf   : > { %v793_v11 = vpop.permute.xlu0 %792 }
  0xd0   : > { %v2399_v20 = vsel %vm843_vm8, %v826_v12, %v793_v11 }
  0xd1   : > { %958 = vrot.lane.b32.xlu0 %v2381_v17, %s1942_s9  ;;  %v894_v30 = vpop.permute.xlu1 %893 }
  0xd2   : > { %974 = vrot.lane.b32.xlu1 %v2388_v10, %s1942_s9  ;;  %v898_v25 = vsel %vm810_vm6, %v2255_v24, %v894_v30 }
  0xd3   : > { %v763_v13 = vpop.permute.xlu0 %762 }
  0xd4   : > { %v828_v21 = vsel %vm810_vm6, %v2262_v41, %v763_v13 }
  0xd5   : > { %960 = vrot.lane.b32.xlu0 %v2399_v20, %s1942_s9  ;;  %v795_v15 = vpop.permute.xlu1 %794 }
  0xd6   : > { %976 = vrot.lane.b32.xlu1 %v2406_v19, %s1942_s9  ;;  %v861_v27 = vsel %vm843_vm8, %v828_v21, %v795_v15 }
  0xd7   : > { %v747_v18 = vpop.permute.xlu0 %746 }
  0xd8   : > { %v812_v50 = vsel %vm810_vm6, %v2231_v1, %v747_v18 }
  0xd9   : > { %929 = vrot.lane.b32.xlu0 %v2399_v20, %s1941_s8  ;;  %v779_v34 = vpop.permute.xlu1 %778 }
  0xda   : > { %v845_v22 = vsel %vm843_vm8, %v812_v50, %v779_v34  ;;  %945 = vrot.lane.b32.xlu1 %v2406_v19, %s1941_s8 }
  0xdb   : > { %v896_v16 = vpop.permute.xlu0 %895 }
  0xdc   : > { %v900_v1 = vsel %vm843_vm8, %v898_v25, %v896_v16 }
  0xdd   : > { %931 = vrot.lane.b32.xlu0 %v861_v27, %s1941_s8 }
  0xde   : > { %947 = vrot.lane.b32.xlu1 %v900_v1, %s1941_s8 }
  0xe1   : > { %962 = vrot.lane.b32.xlu0 %v861_v27, %s1942_s9 }
  0xe2   : > { %978 = vrot.lane.b32.xlu1 %v900_v1, %s1942_s9 }
  0xe5   : > { %964 = vrot.lane.b32.xlu0 %v2307_v40, %s1942_s9 }
  0xe6   : > { %980 = vrot.lane.b32.xlu1 %v845_v22, %s1942_s9 }
 0x118   : > { %v918_v24 = vpop.permute.xlu0 %917 }
 0x119   : > { %v984_v31 = vsel %vm982_vm9, %v845_v22, %v918_v24 }
 0x11c   : > { %v934_v41 = vpop.permute.xlu1 %933  ;;  %v920_v29 = vpop.permute.xlu0 %919 }
 0x11d   : > { %v1000_v38 = vsel %vm982_vm9, %v861_v27, %v934_v41  ;;  %v986_v39 = vsel %vm982_vm9, %v2295_v35, %v920_v29 }
 0x120   : > { %v936_v32 = vpop.permute.xlu1 %935  ;;  %v951_v33 = vpop.permute.xlu0 %950 }
 0x121   : > { %v1017_v36 = vsel %vm1015_vm10, %v984_v31, %v951_v33  ;;  %v1002_v37 = vsel %vm982_vm9, %v2307_v40, %v936_v32 }
 0x122   : > { %1772 = vmatprep.mubr.msk.bf16.mxu0 %vm1063_vm11, %v1017_v36  ;;  %v2501_v36 = vld [vmem:[%s2684_s2] ss:$0 sm:$0xff] }
 0x124   : > { %v967_v44 = vpop.permute.xlu1 %966  ;;  %v953_v42 = vpop.permute.xlu0 %952 }
 0x125   : > { %v1019_v45 = vsel %vm1015_vm10, %v986_v39, %v953_v42  ;;  %v1033_v23 = vsel %vm1015_vm10, %v1000_v38, %v967_v44 }
 0x126   : > { %1773 = vmatmul.mubr.msk.bf16.vlgmr.msra.gmra.mrb[0].mxu0 %vm1063_vm11, %v1019_v45  ;;  %1788 = vmatprep.mubr.msk.bf16.mxu1 %vm1063_vm11, %v1033_v23 }
 0x128   : > { %v969_v43 = vpop.permute.xlu1 %968  ;;  %v922_v48 = vpop.permute.xlu0 %921 }
 0x129   : > { %v1035_v5 = vsel %vm1015_vm10, %v1002_v37, %v969_v43  ;;  %v988_v53 = vsel %vm982_vm9, %v2304_v28, %v922_v48 }
 0x12a   : > { %1789 = vmatmul.mubr.msk.bf16.vlgmr.msra.gmra.mrb[0].mxu1 %vm1063_vm11, %v1035_v5 }
 0x12c   : > { %v938_v35 = vpop.permute.xlu1 %937 }
 0x12d   : > { %v1004_v56 = vsel %vm982_vm9, %v2316_v46, %v938_v35 }
 0x12e   : > { %v924_v51 = vpop.permute.xlu0 %923 }
 0x12f   : > { %v990_v8 = vsel %vm982_vm9, %v2325_v47, %v924_v51 }
 0x130   : > { %v940_v52 = vpop.permute.xlu1 %939 }
 0x131   : > { %v1006_v28 = vsel %vm982_vm9, %v2334_v49, %v940_v52 }
 0x132   : > { %v955_v4 = vpop.permute.xlu0 %954 }
 0x133   : > { %v1021_v55 = vsel %vm1015_vm10, %v988_v53, %v955_v4 }
 0x134   : > { %1776 = vmatprep.mubr.msk.bf16.mxu0 %vm1063_vm11, %v1021_v55  ;;  %v971_v40 = vpop.permute.xlu1 %970 }
 0x135   : > { %v1037_v58 = vsel %vm1015_vm10, %v1004_v56, %v971_v40 }
 0x136   : > { %v957_v59 = vpop.permute.xlu0 %956  ;;  %1792 = vmatprep.mubr.msk.bf16.mxu1 %vm1063_vm11, %v1037_v58 }
 0x137   : > { %v1023_v60 = vsel %vm1015_vm10, %v990_v8, %v957_v59 }
 0x138   : > { %1777 = vmatmul.mubr.msk.bf16.gmra.mrb[4].mxu0 %vm1063_vm11, %v1023_v60  ;;  %v973_v61 = vpop.permute.xlu1 %972 }
 0x139   : > { %v1039_v46 = vsel %vm1015_vm10, %v1006_v28, %v973_v61 }
 0x13a   : > { %v926_v63 = vpop.permute.xlu0 %925  ;;  %1793 = vmatmul.mubr.msk.bf16.gmra.mrb[4].mxu1 %vm1063_vm11, %v1039_v46 }
 0x13b   : > { %v992_v47 = vsel %vm982_vm9, %v2345_v54, %v926_v63 }
 0x13c   : > { %v942_v2 = vpop.permute.xlu1 %941 }
 0x13d   : > { %v1008_v49 = vsel %vm982_vm9, %v2352_v57, %v942_v2 }
 0x13f   : > { %v928_v26 = vpop.permute.xlu0 %927 }
 0x140   : > { %v944_v3 = vpop.permute.xlu1 %943  ;;  %v994_v30 = vsel %vm982_vm9, %v2363_v62, %v928_v26 }
 0x141   : > { %v1010_v54 = vsel %vm982_vm9, %v2370_v0, %v944_v3 }
 0x143   : > { %v959_v6 = vpop.permute.xlu0 %958 }
 0x144   : > { %v1025_v7 = vsel %vm1015_vm10, %v992_v47, %v959_v6  ;;  %v975_v9 = vpop.permute.xlu1 %974 }
 0x145   : > { %1780 = vmatprep.mubr.msk.bf16.mxu0 %vm1063_vm11, %v1025_v7  ;;  %v1041_v11 = vsel %vm1015_vm10, %v1008_v49, %v975_v9 }
 0x146   : > { %1796 = vmatprep.mubr.msk.bf16.mxu1 %vm1063_vm11, %v1041_v11 }
 0x147   : > { %v961_v12 = vpop.permute.xlu0 %960 }
 0x148   : > { %v1027_v13 = vsel %vm1015_vm10, %v994_v30, %v961_v12  ;;  %v977_v14 = vpop.permute.xlu1 %976 }
 0x149   : > { %1781 = vmatmul.mubr.msk.bf16.gmra.mrb[8].mxu0 %vm1063_vm11, %v1027_v13  ;;  %v1043_v57 = vsel %vm1015_vm10, %v1010_v54, %v977_v14 }
 0x14a   : > { %1797 = vmatmul.mubr.msk.bf16.gmra.mrb[8].mxu1 %vm1063_vm11, %v1043_v57 }
 0x14b   : > { %v930_v15 = vpop.permute.xlu0 %929 }
 0x14c   : > { %v946_v18 = vpop.permute.xlu1 %945  ;;  %v996_v62 = vsel %vm982_vm9, %v2381_v17, %v930_v15 }
 0x14d   : > { %v1012_v0 = vsel %vm982_vm9, %v2388_v10, %v946_v18 }
 0x14f   : > { %v932_v50 = vpop.permute.xlu0 %931 }
 0x150   : > { %v948_v21 = vpop.permute.xlu1 %947  ;;  %v998_v27 = vsel %vm982_vm9, %v2399_v20, %v932_v50 }
 0x151   : > { %v1014_v17 = vsel %vm982_vm9, %v2406_v19, %v948_v21 }
 0x153   : > { %v963_v34 = vpop.permute.xlu0 %962 }
 0x154   : > { %v1029_v22 = vsel %vm1015_vm10, %v996_v62, %v963_v34  ;;  %v979_v25 = vpop.permute.xlu1 %978 }
 0x155   : > { %1784 = vmatprep.mubr.msk.bf16.mxu0 %vm1063_vm11, %v1029_v22  ;;  %v1045_v16 = vsel %vm1015_vm10, %v1012_v0, %v979_v25 }
 0x156   : > { %1800 = vmatprep.mubr.msk.bf16.mxu1 %vm1063_vm11, %v1045_v16 }
 0x157   : > { %v965_v1 = vpop.permute.xlu0 %964 }
 0x158   : > { %v1031_v24 = vsel %vm1015_vm10, %v998_v27, %v965_v1  ;;  %v981_v10 = vpop.permute.xlu1 %980 }
 0x159   : > { %1785 = vmatmul.mubr.msk.bf16.gmra.mrb[12].mxu0 %vm1063_vm11, %v1031_v24  ;;  %v1047_v41 = vsel %vm1015_vm10, %v1014_v17, %v981_v10 }
 0x15a   : > { %1801 = vmatmul.mubr.msk.bf16.gmra.mrb[12].mxu1 %vm1063_vm11, %v1047_v41 }
 0x1f9   : > { %v1774_v29 = vpop.f32.mrb[0].mxu0 }
 0x1fa   : > { %1267 = vst.msk [vmem:[#allocation2 + $0x10] sm:$0xff] %vm1264_vm12, %v1774_v29  ;;  %v1137_v20 = vpop.f32.mrb[1].mxu0 }
 0x1fb   : > { %1265 = vst.msk [vmem:[#allocation2] sm:$0xff] %vm1264_vm12, %v1137_v20  ;;  %v1775_v31 = vpop.f32.mrb[2].mxu0 }
 0x1fc   : > { %1268 = vst.msk [vmem:[#allocation2 + $0x18] sm:$0xff] %vm1264_vm12, %v1775_v31  ;;  %v1140_v19 = vpop.f32.mrb[3].mxu0 }
 0x1fd   : > { %1266 = vst.msk [vmem:[#allocation2 + $0x8] sm:$0xff] %vm1264_vm12, %v1140_v19  ;;  %v1790_v32 = vpop.f32.mrb[0].mxu1 }
 0x1fe   : > { %1283 = vst.msk [vmem:[#allocation2 + $0x90] sm:$0xff] %vm1264_vm12, %v1790_v32  ;;  %v1201_v33 = vpop.f32.mrb[1].mxu1 }
 0x1ff   : > { %1281 = vst.msk [vmem:[#allocation2 + $0x80] sm:$0xff] %vm1264_vm12, %v1201_v33  ;;  %v1791_v38 = vpop.f32.mrb[2].mxu1 }
 0x200   : > { %1284 = vst.msk [vmem:[#allocation2 + $0x98] sm:$0xff] %vm1264_vm12, %v1791_v38  ;;  %v1204_v39 = vpop.f32.mrb[3].mxu1 }
 0x201   : > { %v1299_v44 = vld [vmem:[#allocation2 + $0x10] sm:$0xff]  ;;  %1282 = vst.msk [vmem:[#allocation2 + $0x88] sm:$0xff] %vm1264_vm12, %v1204_v39 }
 0x202   : > { %v1338_v42 = vadd.f32 %v2501_v36, %v1299_v44  ;;  %v1297_v45 = vld [vmem:[#allocation2] sm:$0xff] }
 0x203   : > { %v1336_v23 = vadd.f32 %v2501_v36, %v1297_v45  ;;  %v1300_v37 = vld [vmem:[#allocation2 + $0x18] sm:$0xff] }
 0x204   : > { %v1370_v43 = vmax.f32 %v1338_v42, 0.0  ;;  %v1339_v48 = vadd.f32 %v2501_v36, %v1300_v37  ;;  %v1298_v5 = vld [vmem:[#allocation2 + $0x8] sm:$0xff] }
 0x205   : > { %v1368_v35 = vmax.f32 %v1336_v23, 0.0  ;;  %v1337_v51 = vadd.f32 %v2501_v36, %v1298_v5  ;;  %v1315_v52 = vld [vmem:[#allocation2 + $0x90] sm:$0xff] }
 0x206   : > { %v1719_v53 = vpack.c.bf16 %v1370_v43, %v1370_v43  ;;  %v1371_v4 = vmax.f32 %v1339_v48, 0.0  ;;  %v1354_v55 = vadd.f32 %v2501_v36, %v1315_v52  ;;  %v1313_v56 = vld [vmem:[#allocation2 + $0x80] sm:$0xff] }
 0x207   : > { %v1717_v40 = vpack.c.bf16 %v1368_v35, %v1368_v35  ;;  %v1369_v58 = vmax.f32 %v1337_v51, 0.0  ;;  %v1352_v8 = vadd.f32 %v2501_v36, %v1313_v56  ;;  %v1316_v59 = vld [vmem:[#allocation2 + $0x98] sm:$0xff] }
 0x208   : > { %1531 = vst.msk [vmem:[%s2514_s20 + $0x8] sm:$0xf] %vm1528_vm13, %v1719_v53  ;;  %v1720_v60 = vpack.c.bf16 %v1371_v4, %v1371_v4  ;;  %v1386_v28 = vmax.f32 %v1354_v55, 0.0  ;;  %v1355_v61 = vadd.f32 %v2501_v36, %v1316_v59  ;;  %v1314_v46 = vld [vmem:[#allocation2 + $0x88] sm:$0xff] }
 0x209   : > { %1529 = vst.msk [vmem:[%s2514_s20] sm:$0xf] %vm1528_vm13, %v1717_v40  ;;  %v1718_v63 = vpack.c.bf16 %v1369_v58, %v1369_v58  ;;  %v1384_v2 = vmax.f32 %v1352_v8, 0.0  ;;  %v1353_v26 = vadd.f32 %v2501_v36, %v1314_v46 }
 0x20a   : > { %1532 = vst.msk [vmem:[%s2514_s20 + $0xc] sm:$0xf] %vm1528_vm13, %v1720_v60  ;;  %v1735_v3 = vpack.c.bf16 %v1386_v28, %v1386_v28  ;;  %v1387_v47 = vmax.f32 %v1355_v61, 0.0 }
 0x20b   : > { %1530 = vst.msk [vmem:[%s2514_s20 + $0x4] sm:$0xf] %vm1528_vm13, %v1718_v63  ;;  %v1733_v6 = vpack.c.bf16 %v1384_v2, %v1384_v2  ;;  %v1385_v7 = vmax.f32 %v1353_v26, 0.0  ;;  %v1778_v49 = vpop.f32.mrb[4].mxu0 }
 0x20c   : > { %1547 = vst.msk [vmem:[%s2514_s20 + $0x48] sm:$0xf] %vm1528_vm13, %v1735_v3  ;;  %v1736_v9 = vpack.c.bf16 %v1387_v47, %v1387_v47  ;;  %v1153_v11 = vpop.f32.mrb[5].mxu0 }
 0x20d   : > { %1271 = vst.msk [vmem:[#allocation2 + $0x30] sm:$0xff] %vm1264_vm12, %v1778_v49  ;;  %v1734_v30 = vpack.c.bf16 %v1385_v7, %v1385_v7  ;;  %1269 = vst.msk [vmem:[#allocation2 + $0x20] sm:$0xff] %vm1264_vm12, %v1153_v11  ;;  %v1779_v12 = vpop.f32.mrb[6].mxu0  ;;  %v1794_v13 = vpop.f32.mrb[4].mxu1 }
 0x20e   : > { %1545 = vst.msk [vmem:[%s2514_s20 + $0x40] sm:$0xf] %vm1528_vm13, %v1733_v6  ;;  %1548 = vst.msk [vmem:[%s2514_s20 + $0x4c] sm:$0xf] %vm1528_vm13, %v1736_v9  ;;  %v1156_v54 = vpop.f32.mrb[7].mxu0  ;;  %v1217_v14 = vpop.f32.mrb[5].mxu1 }
 0x20f   : > { %1272 = vst.msk [vmem:[#allocation2 + $0x38] sm:$0xff] %vm1264_vm12, %v1779_v12  ;;  %1287 = vst.msk [vmem:[#allocation2 + $0xb0] sm:$0xff] %vm1264_vm12, %v1794_v13  ;;  %v1795_v57 = vpop.f32.mrb[6].mxu1 }
 0x210   : > { %1546 = vst.msk [vmem:[%s2514_s20 + $0x44] sm:$0xf] %vm1528_vm13, %v1734_v30  ;;  %v1220_v15 = vpop.f32.mrb[7].mxu1 }
 0x211   : > { %1270 = vst.msk [vmem:[#allocation2 + $0x28] sm:$0xff] %vm1264_vm12, %v1156_v54  ;;  %1285 = vst.msk [vmem:[#allocation2 + $0xa0] sm:$0xff] %vm1264_vm12, %v1217_v14 }
 0x212   : > { %1288 = vst.msk [vmem:[#allocation2 + $0xb8] sm:$0xff] %vm1264_vm12, %v1795_v57  ;;  %1286 = vst.msk [vmem:[#allocation2 + $0xa8] sm:$0xff] %vm1264_vm12, %v1220_v15 }
 0x214   : > { %v1303_v18 = vld [vmem:[#allocation2 + $0x30] sm:$0xff]  ;;  %v1301_v21 = vld [vmem:[#allocation2 + $0x20] sm:$0xff] }
 0x215   : > { %v1342_v50 = vadd.f32 %v2501_v36, %v1303_v18  ;;  %v1340_v62 = vadd.f32 %v2501_v36, %v1301_v21 }
 0x216   : > { %v1304_v34 = vld [vmem:[#allocation2 + $0x38] sm:$0xff]  ;;  %v1319_v22 = vld [vmem:[#allocation2 + $0xb0] sm:$0xff] }
 0x217   : > { %v1374_v0 = vmax.f32 %v1342_v50, 0.0  ;;  %v1343_v25 = vadd.f32 %v2501_v36, %v1304_v34  ;;  %v1358_v27 = vadd.f32 %v2501_v36, %v1319_v22  ;;  %v1372_v24 = vmax.f32 %v1340_v62, 0.0 }
 0x218   : > { %v1302_v16 = vld [vmem:[#allocation2 + $0x28] sm:$0xff]  ;;  %v1317_v1 = vld [vmem:[#allocation2 + $0xa0] sm:$0xff] }
 0x219   : > { %v1341_v17 = vadd.f32 %v2501_v36, %v1302_v16  ;;  %v1356_v10 = vadd.f32 %v2501_v36, %v1317_v1  ;;  %v1320_v41 = vld [vmem:[#allocation2 + $0xb8] sm:$0xff]  ;;  %v1723_v29 = vpack.c.bf16 %v1374_v0, %v1374_v0  ;;  %v1375_v20 = vmax.f32 %v1343_v25, 0.0  ;;  %v1318_v32 = vld [vmem:[#allocation2 + $0xa8] sm:$0xff] }
 0x21a   : > { %v1390_v31 = vmax.f32 %v1358_v27, 0.0  ;;  %v1359_v19 = vadd.f32 %v2501_v36, %v1320_v41  ;;  %v1721_v33 = vpack.c.bf16 %v1372_v24, %v1372_v24  ;;  %v1357_v44 = vadd.f32 %v2501_v36, %v1318_v32 }
 0x21b   : > { %v1373_v38 = vmax.f32 %v1341_v17, 0.0  ;;  %v1388_v39 = vmax.f32 %v1356_v10, 0.0  ;;  %1535 = vst.msk [vmem:[%s2514_s20 + $0x18] sm:$0xf] %vm1528_vm13, %v1723_v29  ;;  %v1724_v42 = vpack.c.bf16 %v1375_v20, %v1375_v20 }
 0x21c   : > { %v1739_v45 = vpack.c.bf16 %v1390_v31, %v1390_v31  ;;  %v1391_v23 = vmax.f32 %v1359_v19, 0.0  ;;  %1533 = vst.msk [vmem:[%s2514_s20 + $0x10] sm:$0xf] %vm1528_vm13, %v1721_v33  ;;  %v1389_v48 = vmax.f32 %v1357_v44, 0.0  ;;  %v1782_v5 = vpop.f32.mrb[8].mxu0 }
 0x21d   : > { %v1722_v37 = vpack.c.bf16 %v1373_v38, %v1373_v38  ;;  %v1737_v43 = vpack.c.bf16 %v1388_v39, %v1388_v39  ;;  %1536 = vst.msk [vmem:[%s2514_s20 + $0x1c] sm:$0xf] %vm1528_vm13, %v1724_v42  ;;  %v1169_v51 = vpop.f32.mrb[9].mxu0  ;;  %v1798_v4 = vpop.f32.mrb[8].mxu1 }
 0x21e   : > { %1551 = vst.msk [vmem:[%s2514_s20 + $0x58] sm:$0xf] %vm1528_vm13, %v1739_v45  ;;  %v1740_v35 = vpack.c.bf16 %v1391_v23, %v1391_v23  ;;  %v1738_v52 = vpack.c.bf16 %v1389_v48, %v1389_v48  ;;  %v1783_v53 = vpop.f32.mrb[10].mxu0  ;;  %v1233_v56 = vpop.f32.mrb[9].mxu1 }
 0x21f   : > { %1275 = vst.msk [vmem:[#allocation2 + $0x50] sm:$0xff] %vm1264_vm12, %v1782_v5  ;;  %1273 = vst.msk [vmem:[#allocation2 + $0x40] sm:$0xff] %vm1264_vm12, %v1169_v51  ;;  %v1172_v55 = vpop.f32.mrb[11].mxu0  ;;  %v1799_v40 = vpop.f32.mrb[10].mxu1 }
 0x220   : > { %1534 = vst.msk [vmem:[%s2514_s20 + $0x14] sm:$0xf] %vm1528_vm13, %v1722_v37  ;;  %1549 = vst.msk [vmem:[%s2514_s20 + $0x50] sm:$0xf] %vm1528_vm13, %v1737_v43  ;;  %v1236_v58 = vpop.f32.mrb[11].mxu1 }
 0x221   : > { %1552 = vst.msk [vmem:[%s2514_s20 + $0x5c] sm:$0xf] %vm1528_vm13, %v1740_v35  ;;  %1550 = vst.msk [vmem:[%s2514_s20 + $0x54] sm:$0xf] %vm1528_vm13, %v1738_v52 }
 0x222   : > { %1276 = vst.msk [vmem:[#allocation2 + $0x58] sm:$0xff] %vm1264_vm12, %v1783_v53  ;;  %1291 = vst.msk [vmem:[#allocation2 + $0xd0] sm:$0xff] %vm1264_vm12, %v1798_v4 }
 0x223   : > { %1274 = vst.msk [vmem:[#allocation2 + $0x48] sm:$0xff] %vm1264_vm12, %v1172_v55  ;;  %1289 = vst.msk [vmem:[#allocation2 + $0xc0] sm:$0xff] %vm1264_vm12, %v1233_v56 }
 0x224   : > { %1292 = vst.msk [vmem:[#allocation2 + $0xd8] sm:$0xff] %vm1264_vm12, %v1799_v40  ;;  %1290 = vst.msk [vmem:[#allocation2 + $0xc8] sm:$0xff] %vm1264_vm12, %v1236_v58 }
 0x226   : > { %v1307_v8 = vld [vmem:[#allocation2 + $0x50] sm:$0xff]  ;;  %v1305_v60 = vld [vmem:[#allocation2 + $0x40] sm:$0xff] }
 0x227   : > { %v1346_v59 = vadd.f32 %v2501_v36, %v1307_v8  ;;  %v1344_v28 = vadd.f32 %v2501_v36, %v1305_v60 }
 0x229   : > { %v1308_v61 = vld [vmem:[#allocation2 + $0x58] sm:$0xff]  ;;  %v1323_v46 = vld [vmem:[#allocation2 + $0xd0] sm:$0xff]  ;;  %v1378_v63 = vmax.f32 %v1346_v59, 0.0  ;;  %v1376_v6 = vmax.f32 %v1344_v28, 0.0 }
 0x22a   : > { %v1347_v2 = vadd.f32 %v2501_v36, %v1308_v61  ;;  %v1306_v26 = vld [vmem:[#allocation2 + $0x48] sm:$0xff]  ;;  %v1362_v3 = vadd.f32 %v2501_v36, %v1323_v46  ;;  %v1321_v47 = vld [vmem:[#allocation2 + $0xc0] sm:$0xff] }
 0x22b   : > { %v1345_v7 = vadd.f32 %v2501_v36, %v1306_v26  ;;  %v1360_v49 = vadd.f32 %v2501_v36, %v1321_v47  ;;  %v1324_v9 = vld [vmem:[#allocation2 + $0xd8] sm:$0xff]  ;;  %v1727_v11 = vpack.c.bf16 %v1378_v63, %v1378_v63  ;;  %v1322_v54 = vld [vmem:[#allocation2 + $0xc8] sm:$0xff]  ;;  %v1725_v14 = vpack.c.bf16 %v1376_v6, %v1376_v6 }
 0x22c   : > { %v1379_v30 = vmax.f32 %v1347_v2, 0.0  ;;  %v1394_v12 = vmax.f32 %v1362_v3, 0.0  ;;  %v1363_v13 = vadd.f32 %v2501_v36, %v1324_v9  ;;  %v1361_v18 = vadd.f32 %v2501_v36, %v1322_v54  ;;  %v1786_v25 = vpop.f32.mrb[12].mxu0 }
 0x22d   : > { %v1377_v57 = vmax.f32 %v1345_v7, 0.0  ;;  %v1392_v15 = vmax.f32 %v1360_v49, 0.0  ;;  %1539 = vst.msk [vmem:[%s2514_s20 + $0x28] sm:$0xf] %vm1528_vm13, %v1727_v11  ;;  %1537 = vst.msk [vmem:[%s2514_s20 + $0x20] sm:$0xf] %vm1528_vm13, %v1725_v14 }
 0x22e   : > { %v1728_v50 = vpack.c.bf16 %v1379_v30, %v1379_v30  ;;  %v1743_v21 = vpack.c.bf16 %v1394_v12, %v1394_v12  ;;  %v1395_v62 = vmax.f32 %v1363_v13, 0.0  ;;  %v1393_v0 = vmax.f32 %v1361_v18, 0.0  ;;  %1279 = vst.msk [vmem:[#allocation2 + $0x70] sm:$0xff] %vm1264_vm12, %v1786_v25  ;;  %v1185_v27 = vpop.f32.mrb[13].mxu0  ;;  %v1802_v17 = vpop.f32.mrb[12].mxu1 }
 0x22f   : > { %v1726_v34 = vpack.c.bf16 %v1377_v57, %v1377_v57  ;;  %v1741_v22 = vpack.c.bf16 %v1392_v15, %v1392_v15  ;;  %1277 = vst.msk [vmem:[#allocation2 + $0x60] sm:$0xff] %vm1264_vm12, %v1185_v27  ;;  %v1787_v24 = vpop.f32.mrb[14].mxu0  ;;  %1295 = vst.msk [vmem:[#allocation2 + $0xf0] sm:$0xff] %vm1264_vm12, %v1802_v17  ;;  %v1249_v41 = vpop.f32.mrb[13].mxu1 }
 0x230   : > { %1540 = vst.msk [vmem:[%s2514_s20 + $0x2c] sm:$0xf] %vm1528_vm13, %v1728_v50  ;;  %1555 = vst.msk [vmem:[%s2514_s20 + $0x68] sm:$0xf] %vm1528_vm13, %v1743_v21  ;;  %v1744_v16 = vpack.c.bf16 %v1395_v62, %v1395_v62  ;;  %v1742_v1 = vpack.c.bf16 %v1393_v0, %v1393_v0  ;;  %v1188_v10 = vpop.f32.mrb[15].mxu0  ;;  %v1803_v29 = vpop.f32.mrb[14].mxu1 }
 0x231   : > { %1538 = vst.msk [vmem:[%s2514_s20 + $0x24] sm:$0xf] %vm1528_vm13, %v1726_v34  ;;  %1553 = vst.msk [vmem:[%s2514_s20 + $0x60] sm:$0xf] %vm1528_vm13, %v1741_v22  ;;  %v1252_v20 = vpop.f32.mrb[15].mxu1 }
 0x232   : > { %1556 = vst.msk [vmem:[%s2514_s20 + $0x6c] sm:$0xf] %vm1528_vm13, %v1744_v16  ;;  %1554 = vst.msk [vmem:[%s2514_s20 + $0x64] sm:$0xf] %vm1528_vm13, %v1742_v1 }
 0x233   : > { %1280 = vst.msk [vmem:[#allocation2 + $0x78] sm:$0xff] %vm1264_vm12, %v1787_v24  ;;  %1278 = vst.msk [vmem:[#allocation2 + $0x68] sm:$0xff] %vm1264_vm12, %v1188_v10 }
 0x234   : > { %1293 = vst.msk [vmem:[#allocation2 + $0xe0] sm:$0xff] %vm1264_vm12, %v1249_v41  ;;  %1296 = vst.msk [vmem:[#allocation2 + $0xf8] sm:$0xff] %vm1264_vm12, %v1803_v29 }
 0x235   : > { %1294 = vst.msk [vmem:[#allocation2 + $0xe8] sm:$0xff] %vm1264_vm12, %v1252_v20  ;;  %v1311_v31 = vld [vmem:[#allocation2 + $0x70] sm:$0xff] }
 0x236   : > { %v1350_v19 = vadd.f32 %v2501_v36, %v1311_v31  ;;  %v1309_v32 = vld [vmem:[#allocation2 + $0x60] sm:$0xff]  ;;  %v1327_v39 = vld [vmem:[#allocation2 + $0xf0] sm:$0xff] }
 0x237   : > { %v1348_v33 = vadd.f32 %v2501_v36, %v1309_v32  ;;  %v1366_v23 = vadd.f32 %v2501_v36, %v1327_v39 }
 0x238   : > { %v1382_v44 = vmax.f32 %v1350_v19, 0.0 }
 0x239   : > { %v1380_v43 = vmax.f32 %v1348_v33, 0.0  ;;  %v1398_v53 = vmax.f32 %v1366_v23, 0.0 }
 0x23a   : > { %v1312_v38 = vld [vmem:[#allocation2 + $0x78] sm:$0xff]  ;;  %v1310_v45 = vld [vmem:[#allocation2 + $0x68] sm:$0xff]  ;;  %v1731_v51 = vpack.c.bf16 %v1382_v44, %v1382_v44 }
 0x23b   : > { %v1351_v42 = vadd.f32 %v2501_v36, %v1312_v38  ;;  %v1325_v37 = vld [vmem:[#allocation2 + $0xe0] sm:$0xff]  ;;  %v1349_v48 = vadd.f32 %v2501_v36, %v1310_v45  ;;  %v1328_v35 = vld [vmem:[#allocation2 + $0xf8] sm:$0xff]  ;;  %v1729_v56 = vpack.c.bf16 %v1380_v43, %v1380_v43  ;;  %v1747_v60 = vpack.c.bf16 %v1398_v53, %v1398_v53 }
 0x23c   : > { %v1364_v5 = vadd.f32 %v2501_v36, %v1325_v37  ;;  %v1367_v4 = vadd.f32 %v2501_v36, %v1328_v35  ;;  %v1326_v55 = vld [vmem:[#allocation2 + $0xe8] sm:$0xff]  ;;  %1543 = vst.msk [vmem:[%s2514_s20 + $0x38] sm:$0xf] %vm1528_vm13, %v1731_v51 }
 0x23d   : > { %v1383_v52 = vmax.f32 %v1351_v42, 0.0  ;;  %v1381_v40 = vmax.f32 %v1349_v48, 0.0  ;;  %v1365_v8 = vadd.f32 %v2501_v36, %v1326_v55  ;;  %1541 = vst.msk [vmem:[%s2514_s20 + $0x30] sm:$0xf] %vm1528_vm13, %v1729_v56  ;;  %1559 = vst.msk [vmem:[%s2514_s20 + $0x78] sm:$0xf] %vm1528_vm13, %v1747_v60 }
 0x23e   : > { %v1396_v58 = vmax.f32 %v1364_v5, 0.0  ;;  %v1399_v28 = vmax.f32 %v1367_v4, 0.0 }
 0x23f   : > { %v1732_v59 = vpack.c.bf16 %v1383_v52, %v1383_v52  ;;  %v1730_v61 = vpack.c.bf16 %v1381_v40, %v1381_v40  ;;  %v1397_v63 = vmax.f32 %v1365_v8, 0.0 }
 0x240   : > { %v1745_v46 = vpack.c.bf16 %v1396_v58, %v1396_v58  ;;  %v1748_v36 = vpack.c.bf16 %v1399_v28, %v1399_v28 }
 0x241   : > { %1544 = vst.msk [vmem:[%s2514_s20 + $0x3c] sm:$0xf] %vm1528_vm13, %v1732_v59  ;;  %1542 = vst.msk [vmem:[%s2514_s20 + $0x34] sm:$0xf] %vm1528_vm13, %v1730_v61  ;;  %v1746_v2 = vpack.c.bf16 %v1397_v63, %v1397_v63 }
 0x242   : > { %1557 = vst.msk [vmem:[%s2514_s20 + $0x70] sm:$0xf] %vm1528_vm13, %v1745_v46  ;;  %1560 = vst.msk [vmem:[%s2514_s20 + $0x7c] sm:$0xf] %vm1528_vm13, %v1748_v36 }
 0x243   : > { %1558 = vst.msk [vmem:[%s2514_s20 + $0x74] sm:$0xf] %vm1528_vm13, %v1746_v2 }
 0x244   : > { %1886 = shalt.err (!%p1883_p3)
}
 0x245   : > { %s1887_s6 = scalar_lea.hbm %s2627_s27, 2048  ;;  %s1891_s9 = scalar_lea.hbm %s2685_s3, 4096 }
 0x246   : > { %p1888_p4 = scmp.ne.s32.totalorder %s2627_s27, %s1887_s6  ;;  %p1892_p9 = scmp.lt.u32.totalorder %s2627_s27, %s2685_s3 }
 0x247   : > { %p1893_p10 = scmp.lt.u32.totalorder %s1891_s9, %s1887_s6  ;;  %p1895_p12 = scmp.lt.u32.totalorder %s1887_s6, %s2627_s27 }
 0x248   : > { %p1889_p7 = pnand %p1888_p4, %p2004_p5 }
 0x249   : > { %p1894_p11 = por %p1893_p10, %p1892_p9 }
 0x24a   : > { %p1890_p8 = pneg %p1889_p7 }
 0x24b   : > { %p1896_p13 = por %p1895_p12, %p1894_p11 }
 0x24d   : > { %p1897_p0 = pnand %p1896_p13, %p1890_p8 }
 0x24f   : > { %1900 = shalt.err (!%p1897_p0)
}
 0x250   : > { %s1944_s17 = smov 64   ;;  %s1945_s19 = smov 4  }
 0x251   : > { %1808 = dma.vmem_to_hbm [thread:$0]  (%p2004_p5), %s2629_s25, 2048, %s2627_s27, %s2641_s28, %s1944_s17, %s1944_s17, %s1945_s19  }
 0x252 PF: > { %p1814_p1 = scmp.ge.s32.totalorder %s1935_s15, 2  ;;  %s1590_s20 = sand.u32 1, %s1923_s12  }
 0x253   : > { %s1591_s24 = scalar_lea.sflag [#allocation4], %s1590_s20 }
 0x254   : > { %p1811_p2 = pnand %p1814_p1, %p2008_p6 }
 0x256   : > { %1918 = dma.done.wait (!%p1811_p2), %s1591_s24, 2048  }
 0x257   : > { %1920 = vsyncadd (!%p1811_p2), %s1591_s24, 4294965248  ;;  %p13_p3 = scmp.ge.s32.totalorder %s1991_s18, 4   ;;  %s2690_s12 = smov %s1927_s13 }
 0x258   : > { %s2691_s13 = smov %s1931_s14  ;;  %s2692_s14 = smov %s2002_s21 }
 0x259   : > { %s2693_s15 = smov %s1991_s18  ;;  %15 = sbr.rel (!%p13_p3) target bundleno = 3 (0x3), region = 67 }
 0x260   :  { %1596 = vsyncpa [#allocation4], 1 }
 0x261   :  { %1598 = vsyncpa [#allocation4 + $0x1], 1 }

</bundles_post_ra>
